<compile_context>
chip_gen: v7x
topology: tpu7x:2x2x1
jax: 0.10.0
libtpu: 0.0.40
codegen_flags: <defaults>
</compile_context>

<pallas_src>
import jax
import jax.numpy as jnp
import numpy as np
from jax.experimental import pallas as pl
from jax.experimental.pallas import tpu as pltpu

K = 3  # kernel_size of AdaptiveAngleConv (stride=1, padding=1, dilation=1)


# ---------------------------------------------------------------------------
# Kernel-weight rotation (glue, plain JAX) — reproduces _rotate_kernel exactly
# for n = angle // 45 in {1, 2, 3, 4} (the cases exercised by forward()).
# ---------------------------------------------------------------------------
def _rotation_map(n):
    # list of ((dst_h, dst_w), (src_h, src_w)) on the 3x3 spatial grid
    if n == 0:
        return [((i, j), (i, j)) for i in range(3) for j in range(3)]
    if n == 1:  # 45 deg
        return [((0, 1), (0, 0)), ((0, 2), (0, 1)), ((1, 2), (0, 2)),
                ((2, 2), (1, 2)), ((2, 0), (2, 1)), ((2, 1), (2, 2)),
                ((0, 0), (1, 0)), ((1, 0), (2, 0)), ((1, 1), (1, 1))]
    if n == 2:  # 90 deg: new[j, 2-i] = orig[i, j]
        return [((j, 2 - i), (i, j)) for i in range(3) for j in range(3)]
    if n == 3:  # 135 deg
        return [((1, 2), (0, 0)), ((2, 2), (0, 1)), ((2, 1), (0, 2)),
                ((2, 0), (1, 2)), ((0, 0), (2, 1)), ((1, 0), (2, 2)),
                ((0, 1), (2, 0)), ((0, 2), (1, 0)), ((1, 1), (1, 1))]
    if n == 4:  # 180 deg: new[i, j] = orig[2-i, 2-j]
        return [((i, j), (2 - i, 2 - j)) for i in range(3) for j in range(3)]
    raise ValueError(f"unsupported rotation index {n}")


def rotate_weight(w_oihw, angle):
    """Rotate a (Cout, Cin, 3, 3) conv weight by `angle` (multiple of 45)."""
    n = angle // 45
    new_w = jnp.zeros_like(w_oihw)
    for (dh, dw), (sh, sw) in _rotation_map(n):
        new_w = new_w.at[:, :, dh, dw].set(w_oihw[:, :, sh, sw])
    return new_w


# ---------------------------------------------------------------------------
# Pallas kernel: 3x3 / stride 1 / dilation 1 / padding 1 conv of one batch
# element against the branch-fused weight: 9 accumulating MXU matmuls.
# ---------------------------------------------------------------------------
def aac_fused_conv_kernel(xp_ref, w_ref, b_ref, o_ref):
    # xp_ref: (1, H+2, W+2, Cin)  zero-padded bf16 NHWC input for batch n
    # w_ref : (9, Cin, Cpad)      bf16 fused weight (5 branches along Cout,
    #                             zero-padded to a multiple of 128 lanes)
    # b_ref : (1, Cpad)           f32 bias (tiled over branches, zero-padded)
    # o_ref : (1, H*W, Cpad)      f32 lane-dense output slab
    Hp, Wp, cin = xp_ref.shape[1], xp_ref.shape[2], xp_ref.shape[3]
    H, W = Hp - 2, Wp - 2
    cpad = o_ref.shape[2]

    xp = xp_ref[0]                                   # (H+2, W+2, Cin), one load
    # seed the accumulator with the (broadcast) bias, accumulate in f32
    acc = jnp.broadcast_to(b_ref[0][None, :], (H * W, cpad))
    for t in range(K * K):
        kh, kw = t // K, t % K
        tap = xp[kh:kh + H, kw:kw + W, :].reshape(H * W, cin)   # (H*W, Cin)
        acc = acc + jnp.dot(tap, w_ref[t],
                            preferred_element_type=jnp.float32)
    o_ref[0] = acc.astype(o_ref.dtype)


# ---------------------------------------------------------------------------
# Wrapper: builds the fused (branch-concatenated) weight, pads the input,
# runs one pallas_call over a batch grid, returns the 5 NCHW outputs.
# ---------------------------------------------------------------------------
def adaptive_angle_conv(x_nchw, weight_oihw, bias,
                        angle_list=(0, 45, 90, 135, 180)):
    N, Cin, H, W = x_nchw.shape
    Cout = weight_oihw.shape[0]
    nb = len(angle_list)

    # branch 0 = baseline, branches 1.. = rotated weights (same bias)
    ws = [weight_oihw] + [rotate_weight(weight_oihw, angle_list[i])
                          for i in range(1, nb)]
    # OIHW -> HWIO, fused along Cout: (3, 3, Cin, nb*Cout)
    w_hwio = jnp.concatenate([jnp.transpose(w, (2, 3, 1, 0)) for w in ws],
                             axis=-1)

    nbc = nb * Cout
    cpad = ((nbc + 127) // 128) * 128            # lane-dense output width
    w_hwio = jnp.pad(w_hwio, ((0, 0), (0, 0), (0, 0), (0, cpad - nbc)))
    # tap-major weight: (9, Cin, Cpad), tap index t = kh*3 + kw
    w3 = w_hwio.reshape(K * K, Cin, cpad).astype(jnp.bfloat16)

    b_full = jnp.pad(jnp.tile(bias.astype(jnp.float32), nb),
                     (0, cpad - nbc)).reshape(1, cpad)

    x_nhwc = jnp.transpose(x_nchw, (0, 2, 3, 1)).astype(jnp.bfloat16)
    xp = jnp.pad(x_nhwc, ((0, 0), (1, 1), (1, 1), (0, 0)))   # padding=1

    out = pl.pallas_call(
        aac_fused_conv_kernel,
        out_shape=jax.ShapeDtypeStruct((N, H * W, cpad), jnp.float32),
        grid_spec=pltpu.PrefetchScalarGridSpec(
            num_scalar_prefetch=0,
            grid=(N,),
            in_specs=[
                pl.BlockSpec((1, H + 2, W + 2, Cin), lambda n: (n, 0, 0, 0)),
                pl.BlockSpec((K * K, Cin, cpad), lambda n: (0, 0, 0)),
                pl.BlockSpec((1, cpad), lambda n: (0, 0)),
            ],
            out_specs=pl.BlockSpec((1, H * W, cpad), lambda n: (n, 0, 0)),
        ),
        compiler_params=pltpu.CompilerParams(
            dimension_semantics=("parallel",)),
    )(xp, w3, b_full)

    # un-pad, split branches, back to PyTorch-style list of NCHW tensors:
    # [y, y_45, y_90, y_135, y_180]
    out = out.reshape(N, H, W, cpad)[..., :nbc].reshape(N, H, W, nb, Cout)
    return [jnp.transpose(out[..., i, :], (0, 3, 1, 2)) for i in range(nb)]


# ---------------------------------------------------------------------------
# Pure-JAX reference (for verification)
# ---------------------------------------------------------------------------
def ref_conv_nchw(x_nchw, w_oihw, bias):
    y = jax.lax.conv_general_dilated(
        x_nchw, w_oihw, window_strides=(1, 1), padding=((1, 1), (1, 1)),
        dimension_numbers=("NCHW", "OIHW", "NCHW"))
    return y + bias[None, :, None, None]


if __name__ == "__main__":
    key = jax.random.PRNGKey(0)
    kx, kw, kb = jax.random.split(key, 3)

    N, Cin, Cout, H, W = 2, 4, 8, 16, 16
    angle_list = (0, 45, 90, 135, 180)

    x = jax.random.normal(kx, (N, Cin, H, W), dtype=jnp.float32)
    weight = jax.random.normal(kw, (Cout, Cin, K, K), dtype=jnp.float32) * 0.1
    bias = jax.random.normal(kb, (Cout,), dtype=jnp.float32) * 0.1

    outs = adaptive_angle_conv(x, weight, bias, angle_list)
    outs = [jax.block_until_ready(o) for o in outs]

    # The Pallas path runs the matmuls with bf16 inputs (f32 accumulation), so
    # verify against a reference conv fed the same bf16-rounded inputs.
    x_ref = x.astype(jnp.bfloat16).astype(jnp.float32)
    ws_ref = [weight] + [rotate_weight(weight, angle_list[i])
                         for i in range(1, len(angle_list))]
    for o, wr in zip(outs, ws_ref):
        wr_ref = wr.astype(jnp.bfloat16).astype(jnp.float32)
        r = ref_conv_nchw(x_ref, wr_ref, bias)
        np.testing.assert_allclose(np.asarray(o), np.asarray(r),
                                   rtol=2e-3, atol=2e-3)

    print("KERNEL_OK")
</pallas_src>

<mosaic_0001>
module attributes {stable_mosaic.version = 11 : i64} {
  func.func @aac_fused_conv_kernel(%arg0: i32, %arg1: memref<1x18x18x4xbf16, #tpu.memory_space<vmem>>, %arg2: memref<9x4x128xbf16, #tpu.memory_space<vmem>>, %arg3: memref<1x128xf32, #tpu.memory_space<vmem>>, %arg4: memref<1x256x128xf32, #tpu.memory_space<vmem>>) attributes {dimension_semantics = [#tpu.dimension_semantics<parallel>], iteration_bounds = array<i64: 2>, scalar_prefetch = 0 : i64, scratch_operands = 0 : i64, tpu.core_type = #tpu.core_type<tc>, window_params = [{transform_indices = @transform_0, window_bounds = array<i64: 1, 18, 18, 4>}, {pipeline_mode = #tpu.pipeline_mode<synchronous>, transform_indices = @transform_1, window_bounds = array<i64: 9, 4, 128>}, {pipeline_mode = #tpu.pipeline_mode<synchronous>, transform_indices = @transform_2, window_bounds = array<i64: 1, 128>}, {transform_indices = @transform_3, window_bounds = array<i64: 1, 256, 128>}]} {
    %c0 = arith.constant 0 : index
    %c0_0 = arith.constant 0 : index
    %c0_1 = arith.constant 0 : index
    %c0_2 = arith.constant 0 : index
    %0 = vector.load %arg1[%c0, %c0_0, %c0_1, %c0_2] : memref<1x18x18x4xbf16, #tpu.memory_space<vmem>>, vector<1x18x18x4xbf16>
    %1 = vector.shape_cast %0 : vector<1x18x18x4xbf16> to vector<18x18x4xbf16>
    %c0_3 = arith.constant 0 : index
    %c0_4 = arith.constant 0 : index
    %2 = vector.load %arg3[%c0_3, %c0_4] : memref<1x128xf32, #tpu.memory_space<vmem>>, vector<1x128xf32>
    %3 = vector.shape_cast %2 : vector<1x128xf32> to vector<128xf32>
    %4 = vector.shape_cast %3 : vector<128xf32> to vector<1x128xf32>
    %5 = vector.shape_cast %4 : vector<1x128xf32> to vector<1x128xf32>
    %6 = vector.broadcast %5 : vector<1x128xf32> to vector<256x128xf32>
    %7 = vector.extract_strided_slice %1 {offsets = [0, 0, 0], sizes = [16, 16, 4], strides = [1, 1, 1]} : vector<18x18x4xbf16> to vector<16x16x4xbf16>
    %8 = vector.shape_cast %7 : vector<16x16x4xbf16> to vector<256x4xbf16>
    %c0_5 = arith.constant 0 : index
    %c0_6 = arith.constant 0 : index
    %c0_7 = arith.constant 0 : index
    %9 = vector.load %arg2[%c0_5, %c0_6, %c0_7] : memref<9x4x128xbf16, #tpu.memory_space<vmem>>, vector<1x4x128xbf16>
    %10 = vector.shape_cast %9 : vector<1x4x128xbf16> to vector<4x128xbf16>
    %cst = arith.constant dense<0.000000e+00> : vector<256x128xf32>
    %11 = tpu.matmul %8, %10, %cst {dimension_numbers = #tpu.dot_dimension_numbers<[1], [0], [0], [1], [0, 0, 1, 1], [], []>} : vector<256x4xbf16>, vector<4x128xbf16>, vector<256x128xf32> -> vector<256x128xf32>
    %12 = arith.addf %6, %11 : vector<256x128xf32>
    %13 = vector.extract_strided_slice %1 {offsets = [0, 1, 0], sizes = [16, 16, 4], strides = [1, 1, 1]} : vector<18x18x4xbf16> to vector<16x16x4xbf16>
    %14 = vector.shape_cast %13 : vector<16x16x4xbf16> to vector<256x4xbf16>
    %c1 = arith.constant 1 : index
    %c0_8 = arith.constant 0 : index
    %c0_9 = arith.constant 0 : index
    %15 = vector.load %arg2[%c1, %c0_8, %c0_9] : memref<9x4x128xbf16, #tpu.memory_space<vmem>>, vector<1x4x128xbf16>
    %16 = vector.shape_cast %15 : vector<1x4x128xbf16> to vector<4x128xbf16>
    %cst_10 = arith.constant dense<0.000000e+00> : vector<256x128xf32>
    %17 = tpu.matmul %14, %16, %cst_10 {dimension_numbers = #tpu.dot_dimension_numbers<[1], [0], [0], [1], [0, 0, 1, 1], [], []>} : vector<256x4xbf16>, vector<4x128xbf16>, vector<256x128xf32> -> vector<256x128xf32>
    %18 = arith.addf %12, %17 : vector<256x128xf32>
    %19 = vector.extract_strided_slice %1 {offsets = [0, 2, 0], sizes = [16, 16, 4], strides = [1, 1, 1]} : vector<18x18x4xbf16> to vector<16x16x4xbf16>
    %20 = vector.shape_cast %19 : vector<16x16x4xbf16> to vector<256x4xbf16>
    %c2 = arith.constant 2 : index
    %c0_11 = arith.constant 0 : index
    %c0_12 = arith.constant 0 : index
    %21 = vector.load %arg2[%c2, %c0_11, %c0_12] : memref<9x4x128xbf16, #tpu.memory_space<vmem>>, vector<1x4x128xbf16>
    %22 = vector.shape_cast %21 : vector<1x4x128xbf16> to vector<4x128xbf16>
    %cst_13 = arith.constant dense<0.000000e+00> : vector<256x128xf32>
    %23 = tpu.matmul %20, %22, %cst_13 {dimension_numbers = #tpu.dot_dimension_numbers<[1], [0], [0], [1], [0, 0, 1, 1], [], []>} : vector<256x4xbf16>, vector<4x128xbf16>, vector<256x128xf32> -> vector<256x128xf32>
    %24 = arith.addf %18, %23 : vector<256x128xf32>
    %25 = vector.extract_strided_slice %1 {offsets = [1, 0, 0], sizes = [16, 16, 4], strides = [1, 1, 1]} : vector<18x18x4xbf16> to vector<16x16x4xbf16>
    %26 = vector.shape_cast %25 : vector<16x16x4xbf16> to vector<256x4xbf16>
    %c3 = arith.constant 3 : index
    %c0_14 = arith.constant 0 : index
    %c0_15 = arith.constant 0 : index
    %27 = vector.load %arg2[%c3, %c0_14, %c0_15] : memref<9x4x128xbf16, #tpu.memory_space<vmem>>, vector<1x4x128xbf16>
    %28 = vector.shape_cast %27 : vector<1x4x128xbf16> to vector<4x128xbf16>
    %cst_16 = arith.constant dense<0.000000e+00> : vector<256x128xf32>
    %29 = tpu.matmul %26, %28, %cst_16 {dimension_numbers = #tpu.dot_dimension_numbers<[1], [0], [0], [1], [0, 0, 1, 1], [], []>} : vector<256x4xbf16>, vector<4x128xbf16>, vector<256x128xf32> -> vector<256x128xf32>
    %30 = arith.addf %24, %29 : vector<256x128xf32>
    %31 = vector.extract_strided_slice %1 {offsets = [1, 1, 0], sizes = [16, 16, 4], strides = [1, 1, 1]} : vector<18x18x4xbf16> to vector<16x16x4xbf16>
    %32 = vector.shape_cast %31 : vector<16x16x4xbf16> to vector<256x4xbf16>
    %c4 = arith.constant 4 : index
    %c0_17 = arith.constant 0 : index
    %c0_18 = arith.constant 0 : index
    %33 = vector.load %arg2[%c4, %c0_17, %c0_18] : memref<9x4x128xbf16, #tpu.memory_space<vmem>>, vector<1x4x128xbf16>
    %34 = vector.shape_cast %33 : vector<1x4x128xbf16> to vector<4x128xbf16>
    %cst_19 = arith.constant dense<0.000000e+00> : vector<256x128xf32>
    %35 = tpu.matmul %32, %34, %cst_19 {dimension_numbers = #tpu.dot_dimension_numbers<[1], [0], [0], [1], [0, 0, 1, 1], [], []>} : vector<256x4xbf16>, vector<4x128xbf16>, vector<256x128xf32> -> vector<256x128xf32>
    %36 = arith.addf %30, %35 : vector<256x128xf32>
    %37 = vector.extract_strided_slice %1 {offsets = [1, 2, 0], sizes = [16, 16, 4], strides = [1, 1, 1]} : vector<18x18x4xbf16> to vector<16x16x4xbf16>
    %38 = vector.shape_cast %37 : vector<16x16x4xbf16> to vector<256x4xbf16>
    %c5 = arith.constant 5 : index
    %c0_20 = arith.constant 0 : index
    %c0_21 = arith.constant 0 : index
    %39 = vector.load %arg2[%c5, %c0_20, %c0_21] : memref<9x4x128xbf16, #tpu.memory_space<vmem>>, vector<1x4x128xbf16>
    %40 = vector.shape_cast %39 : vector<1x4x128xbf16> to vector<4x128xbf16>
    %cst_22 = arith.constant dense<0.000000e+00> : vector<256x128xf32>
    %41 = tpu.matmul %38, %40, %cst_22 {dimension_numbers = #tpu.dot_dimension_numbers<[1], [0], [0], [1], [0, 0, 1, 1], [], []>} : vector<256x4xbf16>, vector<4x128xbf16>, vector<256x128xf32> -> vector<256x128xf32>
    %42 = arith.addf %36, %41 : vector<256x128xf32>
    %43 = vector.extract_strided_slice %1 {offsets = [2, 0, 0], sizes = [16, 16, 4], strides = [1, 1, 1]} : vector<18x18x4xbf16> to vector<16x16x4xbf16>
    %44 = vector.shape_cast %43 : vector<16x16x4xbf16> to vector<256x4xbf16>
    %c6 = arith.constant 6 : index
    %c0_23 = arith.constant 0 : index
    %c0_24 = arith.constant 0 : index
    %45 = vector.load %arg2[%c6, %c0_23, %c0_24] : memref<9x4x128xbf16, #tpu.memory_space<vmem>>, vector<1x4x128xbf16>
    %46 = vector.shape_cast %45 : vector<1x4x128xbf16> to vector<4x128xbf16>
    %cst_25 = arith.constant dense<0.000000e+00> : vector<256x128xf32>
    %47 = tpu.matmul %44, %46, %cst_25 {dimension_numbers = #tpu.dot_dimension_numbers<[1], [0], [0], [1], [0, 0, 1, 1], [], []>} : vector<256x4xbf16>, vector<4x128xbf16>, vector<256x128xf32> -> vector<256x128xf32>
    %48 = arith.addf %42, %47 : vector<256x128xf32>
    %49 = vector.extract_strided_slice %1 {offsets = [2, 1, 0], sizes = [16, 16, 4], strides = [1, 1, 1]} : vector<18x18x4xbf16> to vector<16x16x4xbf16>
    %50 = vector.shape_cast %49 : vector<16x16x4xbf16> to vector<256x4xbf16>
    %c7 = arith.constant 7 : index
    %c0_26 = arith.constant 0 : index
    %c0_27 = arith.constant 0 : index
    %51 = vector.load %arg2[%c7, %c0_26, %c0_27] : memref<9x4x128xbf16, #tpu.memory_space<vmem>>, vector<1x4x128xbf16>
    %52 = vector.shape_cast %51 : vector<1x4x128xbf16> to vector<4x128xbf16>
    %cst_28 = arith.constant dense<0.000000e+00> : vector<256x128xf32>
    %53 = tpu.matmul %50, %52, %cst_28 {dimension_numbers = #tpu.dot_dimension_numbers<[1], [0], [0], [1], [0, 0, 1, 1], [], []>} : vector<256x4xbf16>, vector<4x128xbf16>, vector<256x128xf32> -> vector<256x128xf32>
    %54 = arith.addf %48, %53 : vector<256x128xf32>
    %55 = vector.extract_strided_slice %1 {offsets = [2, 2, 0], sizes = [16, 16, 4], strides = [1, 1, 1]} : vector<18x18x4xbf16> to vector<16x16x4xbf16>
    %56 = vector.shape_cast %55 : vector<16x16x4xbf16> to vector<256x4xbf16>
    %c8 = arith.constant 8 : index
    %c0_29 = arith.constant 0 : index
    %c0_30 = arith.constant 0 : index
    %57 = vector.load %arg2[%c8, %c0_29, %c0_30] : memref<9x4x128xbf16, #tpu.memory_space<vmem>>, vector<1x4x128xbf16>
    %58 = vector.shape_cast %57 : vector<1x4x128xbf16> to vector<4x128xbf16>
    %cst_31 = arith.constant dense<0.000000e+00> : vector<256x128xf32>
    %59 = tpu.matmul %56, %58, %cst_31 {dimension_numbers = #tpu.dot_dimension_numbers<[1], [0], [0], [1], [0, 0, 1, 1], [], []>} : vector<256x4xbf16>, vector<4x128xbf16>, vector<256x128xf32> -> vector<256x128xf32>
    %60 = arith.addf %54, %59 : vector<256x128xf32>
    %c0_32 = arith.constant 0 : index
    %c0_33 = arith.constant 0 : index
    %c0_34 = arith.constant 0 : index
    %61 = vector.load %arg4[%c0_32, %c0_33, %c0_34] : memref<1x256x128xf32, #tpu.memory_space<vmem>>, vector<1x256x128xf32>
    %62 = vector.shape_cast %61 : vector<1x256x128xf32> to vector<256x128xf32>
    %63 = vector.shape_cast %60 : vector<256x128xf32> to vector<1x256x128xf32>
    tpu.vector_store %arg4[%c0_32, %c0_33, %c0_34], %63 {strides = array<i32>} : memref<1x256x128xf32, #tpu.memory_space<vmem>>, vector<1x256x128xf32>,
    return
  }
  func.func @transform_0(%arg0: i32) -> (i32, i32, i32, i32) {
    %c0_i32 = arith.constant 0 : i32
    %c0_i32_0 = arith.constant 0 : i32
    %c0_i32_1 = arith.constant 0 : i32
    %c0_i32_2 = arith.constant 0 : i32
    return %arg0, %c0_i32, %c0_i32_0, %c0_i32_1 : i32, i32, i32, i32
  }
  func.func @transform_1(%arg0: i32) -> (i32, i32, i32) {
    %c0_i32 = arith.constant 0 : i32
    %c0_i32_0 = arith.constant 0 : i32
    %c0_i32_1 = arith.constant 0 : i32
    %c0_i32_2 = arith.constant 0 : i32
    return %c0_i32, %c0_i32_0, %c0_i32_1 : i32, i32, i32
  }
  func.func @transform_2(%arg0: i32) -> (i32, i32) {
    %c0_i32 = arith.constant 0 : i32
    %c0_i32_0 = arith.constant 0 : i32
    %c0_i32_1 = arith.constant 0 : i32
    return %c0_i32, %c0_i32_0 : i32, i32
  }
  func.func @transform_3(%arg0: i32) -> (i32, i32, i32) {
    %c0_i32 = arith.constant 0 : i32
    %c0_i32_0 = arith.constant 0 : i32
    %c0_i32_1 = arith.constant 0 : i32
    return %arg0, %c0_i32, %c0_i32_0 : i32, i32, i32
  }
}

</mosaic_0001>

<bundles_post_ra>
// kernel: tpu_custom_call.1
= control target key start
LH: loop header
LB: loop body
LE: loop exit
PB: predicated region body
PF: predicated region fallthrough
CT: control target
= control target key end

     0   :  { %8 = vsyncpa [#allocation3], 0  ;;  %s5433_s0 = inlined_call_operand.vmem [shape: bf16[2,18,18,4], index: 0, kind: input, shape index: {}]   ;;  %s5434_s1 = inlined_call_operand.vmem [shape: bf16[9,4,128], index: 1, kind: input, shape index: {}]   ;;  %s5435_s2 = inlined_call_operand.vmem [shape: f32[1,128], index: 2, kind: input, shape index: {}]   ;;  %s5436_s3 = inlined_call_operand.hbm [shape: f32[2,256,128], index: 3, kind: output, shape index: {}]  }
   0x1   :  { %10 = vsyncpa [#allocation3 + $0x1], 0  ;;  %s4208_s12 = smov 0   ;;  %s4210_s13 = smov 0  }
   0x2   :  { %s4212_s14 = smov 0   ;;  %s4214_s15 = smov 0  }
   0x3 LB: > { %s4229_s16 = sadd.s32 4294967295, %s4183_s15   ;;  %s3064_s17 = sadd.s32 4294967294, %s4183_s15   ;;  %s4183_s15 = sphi %s4214_s15, %s5569_s15   ;;  %s4179_s14 = sphi %s4212_s14, %s5568_s14   ;;  %s4175_s13 = sphi %s4210_s13, %s5567_s13   ;;  %s4171_s12 = sphi %s4208_s12, %s5566_s12  }
   0x4   : > { %s4233_s18 = sadd.s32 1, %s4183_s15   ;;  %s91_s19 = sadd.s32 1, %s4179_s14 }
   0x5   : > { %s88_s20 = ssub.s32 %s4183_s15, %s4233_s18  ;;  %p101_p0 = scmp.ne.s32.totalorder %s4179_s14, %s4175_s13 }
   0x6   : > { %p89_p1 = scmp.eq.s32.totalorder %s88_s20, 0  ;;  %p102_p2 = scmp.eq.s32.totalorder %s4229_s16, 1 }
   0x7   : > { %p107_p3 = scmp.ne.s32.totalorder %s4175_s13, %s4171_s12  ;;  %p108_p4 = scmp.eq.s32.totalorder %s3064_s17, 1 }
   0x8   : > { %s4244_s21 = scalar_select %p89_p1, %s4179_s14, %s91_s19  }
   0x9   : > { %p4246_p5 = por %p102_p2, %p101_p0  ;;  %p4250_p6 = por %p108_p4, %p107_p3 }
   0xa   : > { %p3067_p7 = scmp.ge.s32.totalorder %s4183_s15, 1  ;;  %p140_p8 = scmp.lt.s32.totalorder %s4183_s15, 3 }
   0xc   : > { %p141_p9 = pnand %p3067_p7, %p140_p8 }
   0xe   : > { %144 = sbr.rel (%p141_p9) target bundleno = 562 (0x232), region = 32 }
  0x15   : > { %v231_v0 = vld [vmem:[%s5434_s1] sm:$0x3]  ;;  %vm361_vm0 = vcmask 1041408   ;;  %p164_p10 = scmp.lt.s32.totalorder %s4229_s16, 1  ;;  %v3203_v2 = vld [vmem:[%s5434_s1 + $0x8] sm:$0x3] }
  0x16   : > { %4050 = vmatprep.subr.msk.bf16.mxu1 %vm361_vm0, %v231_v0  ;;  %v363_v1 = vsel %vm361_vm0, %v231_v0, 0  ;;  %v3103_v3 = vld [vmem:[%s5434_s1 + $0x2] sm:$0x3]  ;;  %4054 = vmatprep.subr.msk.bf16.mxu0 %vm361_vm0, %v3203_v2  ;;  %v4271_v4 = vsel %vm361_vm0, %v3203_v2, 0  ;;  %v3222_v5 = vld [vmem:[%s5434_s1 + $0xa] sm:$0x3] }
  0x17   : > { %3455 = vmatpush3.bf16.msra.mxu1 %v363_v1  ;;  %s165_s30 = scalar_select %p164_p10, %s4229_s16, 1  ;;  %5485 = vst [vmem:[#allocation5_spill] sm:$0xff] %v4271_v4  ;;  %3591 = vmatpush3.bf16.msra.mxu0 %v4271_v4  ;;  %vm312_vm1 = vcmask 31744   ;;  %v1044_v13 = vsel %vm361_vm0, %v3103_v3, 0  ;;  %v4313_v15 = vld [vmem:[%s5434_s1 + $0x4] sm:$0x3] }
  0x18   : > { %4051 = vmatprep.subr.msk.bf16.mxu1 %vm361_vm0, %v3103_v3  ;;  %4056 = vmatprep.subr.msk.bf16.mxu0 %vm361_vm0, %v3222_v5  ;;  %vm558_vm2 = vsmask.f32 3328  ;;  %vm559_vm3 = vsmask.f32 7440  ;;  %v4335_v22 = vsel %vm361_vm0, %v3222_v5, 0  ;;  %vm1255_vm5 = vcmask 1042432  }
  0x19   : > { %s4060_s6 = smul.u32 216, %s165_s30  ;;  %vm4375_vm4 = vmor %vm558_vm2, %vm559_vm3  ;;  %vm1256_vm6 = vcmask 1046532   ;;  %s161_s4 = sand.u32 1, %s4175_s13  }
  0x1a   : > { %vm4586_vm7 = vmor %vm1255_vm5, %vm1256_vm6  ;;  %s3068_s7 = sshll.u32 %s161_s4, 8  ;;  %s4185_s24 = smov [#allocation2]  }
  0x1b   : > { %s4282_s9 = scalar_lea.vmem %s5433_s0, %s4060_s6  ;;  %s5315_s8 = scalar_lea.vmem [#allocation2], %s3068_s7 }
  0x1c   : > { %v4285_v6 = vld [vmem:[%s4282_s9] sm:$0xf]  ;;  %v4288_v7 = vld [vmem:[%s4282_s9 + $0x4] sm:$0xf]  ;;  %v4291_v8 = vld [vmem:[%s4282_s9 + $0xc] sm:$0xf] }
  0x1d   : > { %v3071_v9 = vcombine.low %v4285_v6, %v4288_v7  ;;  %v4296_v10 = vld [vmem:[%s4282_s9 + $0x10] sm:$0xf]  ;;  %v4303_v12 = vld [vmem:[%s4282_s9 + $0x18] sm:$0xf]  ;;  %v4308_v14 = vld [vmem:[%s4282_s9 + $0x1c] sm:$0xf] }
  0x1e   : > { %v4300_v11 = vcombine.low %v4291_v8, %v4296_v10  ;;  %v4319_v16 = vcombine.low %v4303_v12, %v4308_v14  ;;  %v610_v17 = vshrl.u32 %v4303_v12, 16  ;;  %v4323_v18 = vld [vmem:[%s4282_s9 + $0x24] sm:$0xf]  ;;  %v4326_v19 = vld [vmem:[%s4282_s9 + $0x28] sm:$0xf]  ;;  %v613_v20 = vshll.u32 %v4303_v12, 16 }
  0x1f   : > { %3456 = vmatprep.mubr.msk.bf16.mxu1 %vm312_vm1, %v3071_v9  ;;  %v4332_v21 = vld [vmem:[%s4282_s9 + $0x14] sm:$0x1]  ;;  %v623_v25 = vshrl.u32 %v4308_v14, 16  ;;  %v586_v26 = vshrl.u32 %v4291_v8, 16  ;;  %v4345_v27 = vcombine.low %v4323_v18, %v4326_v19  ;;  %v589_v28 = vshll.u32 %v4291_v8, 16  ;;  %s3002_s10 = sshll.u32 %s5315_s8, 4  ;;  %s5385_s10 = int_to_ptr.vmem [resolvable:$true] %s3002_s10 }
  0x20   : > { %5486 = vst [vmem:[#allocation6_spill] sm:$0xff] %v4300_v11  ;;  %3457 = vmatmul.mubr.msk.bf16.vlgmr.msra.gmra.mrb[0].mxu1 %vm312_vm1, %v4300_v11  ;;  %5487 = vst [vmem:[#allocation7_spill] sm:$0xff] %v4319_v16  ;;  %v595_v29 = vshll.u32 %v4296_v10, 16  ;;  %v599_v30 = vshrl.u32 %v4296_v10, 16  ;;  %v4351_v31 = vld [vmem:[%s4282_s9 + $0x20] sm:$0x1] }
  0x21   : > { %3489 = vmatpush3.bf16.msra.mxu1 %v1044_v13  ;;  %3460 = vmatprep.mubr.msk.bf16.mxu1 %vm312_vm1, %v4319_v16  ;;  %5488 = vst [vmem:[#allocation8_spill] sm:$0xff] %v4345_v27  ;;  %v634_v32 = vshrl.u32 %v4323_v18, 16  ;;  %v588_v33 = vrot.slane %v586_v26, 4  ;;  %v605_v34 = vshll.u32 %v4332_v21, 16  ;;  %v612_v35 = vrot.slane %v610_v17, 4  ;;  %s4121_s20 = scalar_lea.vmem %s5385_s10, 4096 }
  0x22   : > { %4052 = vmatprep.subr.msk.bf16.mxu1 %vm361_vm0, %v4313_v15  ;;  %v591_v36 = vrot.slane %v589_v28, 5  ;;  %v597_v37 = vrot.slane %v595_v29, 5  ;;  %v601_v38 = vrot.slane %v599_v30, 4  ;;  %v615_v39 = vrot.slane %v613_v20, 5  ;;  %v4356_v40 = vld [vmem:[%s4282_s9 + $0x30] sm:$0xf]  ;;  %p4122_p11 = scmp.ne.s32.totalorder %s5385_s10, %s4121_s20 }
  0x23   : > { %v637_v41 = vshll.u32 %v4323_v18, 16  ;;  %v619_v42 = vshll.u32 %v4308_v14, 16  ;;  %v625_v43 = vrot.slane %v623_v25, 4  ;;  %v629_v44 = vshll.u32 %v4351_v31, 16  ;;  %v4362_v45 = vld [vmem:[%s4282_s9 + $0x34] sm:$0xf] }
  0x24   : > { %v592_v46 = vor.u32 %v591_v36, %v588_v33  ;;  %v602_v47 = vor.u32 %v601_v38, %v597_v37  ;;  %v607_v48 = vrot.slane %v605_v34, 5  ;;  %v616_v49 = vor.u32 %v615_v39, %v612_v35  ;;  %v4367_v50 = vld [vmem:[%s4282_s9 + $0x3c] sm:$0xf]  ;;  %v4370_v51 = vld [vmem:[%s4282_s9 + $0x40] sm:$0xf]  ;;  %p4123_p12 = pnand %p4122_p11, %p4246_p5  ;;  %s4125_s25 = sshll.u32 %s4185_s24, 4  ;;  %s4126_s25 = int_to_ptr.vmem [resolvable:$false] %s4125_s25 }
  0x25   : > { %v647_v52 = vshrl.u32 %v4326_v19, 16  ;;  %v621_v54 = vrot.slane %v619_v42, 5  ;;  %v631_v55 = vrot.slane %v629_v44, 5  ;;  %v4381_v56 = vcombine.low %v4356_v40, %v4362_v45  ;;  %v4393_v1 = vld [vmem:[%s4282_s9 + $0x2c] sm:$0x1]  ;;  %s4127_s26 = scalar_lea.vmem %s4126_s25, 8192  ;;  %p4128_p0 = scmp.lt.s32.totalorder %s5385_s10, %s4126_s25 }
  0x26   : > { %v593_v57 = vrot.slane %v592_v46, 4  ;;  %v603_v58 = vrot.slane %v602_v47, 4  ;;  %v617_v59 = vrot.slane %v616_v49, 4  ;;  %v658_v60 = vshrl.u32 %v4356_v40, 16  ;;  %v4408_v33 = vld [vmem:[%s4282_s9 + $0x38] sm:$0x1]  ;;  %p4124_p13 = pneg %p4123_p12  ;;  %p4129_p1 = scmp.lt.s32.totalorder %s4127_s26, %s4121_s20 }
  0x27   : > { %5491 = vst [vmem:[#allocation9_spill] sm:$0xff] %v4381_v56  ;;  %v626_v61 = vor.u32 %v625_v43, %v621_v54  ;;  %v661_v62 = vshll.u32 %v4356_v40, 16  ;;  %v671_v63 = vshrl.u32 %v4362_v45, 16  ;;  %v4390_v0 = vcombine.low %v4367_v50, %v4370_v51  ;;  %v4421_v38 = vld [vmem:[%s5434_s1 + $0xc] sm:$0x3] }
  0x28   : > { %3461 = vmatmul.mubr.msk.bf16.gmra.mrb[4].mxu1 %vm312_vm1, %v4345_v27  ;;  %v598_v2 = vsel %vm4375_vm4, %v593_v57, %v597_v37  ;;  %v608_v3 = vsel %vm4375_vm4, %v603_v58, %v607_v48  ;;  %v622_v5 = vsel %vm4375_vm4, %v617_v59, %v621_v54  ;;  %v682_v9 = vshrl.u32 %v4367_v50, 16  ;;  %v4416_v37 = vld [vmem:[%s4282_s9 + $0x48] sm:$0xf]  ;;  %v4429_v44 = vld [vmem:[%s4282_s9 + $0x4c] sm:$0xf]  ;;  %p4130_p2 = por %p4129_p1, %p4128_p0 }
  0x29   : > { %3464 = vmatprep.mubr.msk.bf16.mxu1 %vm312_vm1, %v4381_v56  ;;  %5492 = vst [vmem:[#allocation10_spill] sm:$0xff] %v4390_v0  ;;  %v4402_v13 = vcombine.low %v598_v2, %v608_v3  ;;  %v627_v17 = vrot.slane %v626_v61, 4  ;;  %v685_v20 = vshll.u32 %v4367_v50, 16  ;;  %v636_v25 = vrot.slane %v634_v32, 4  ;;  %v4432_v46 = vld [vmem:[%s4282_s9 + $0x54] sm:$0xf] }
  0x2a   : > { %v639_v26 = vrot.slane %v637_v41, 5  ;;  %v643_v28 = vshll.u32 %v4326_v19, 16  ;;  %v649_v29 = vrot.slane %v647_v52, 4  ;;  %v653_v30 = vshll.u32 %v4393_v1, 16  ;;  %v4436_v54 = vld [vmem:[%s4282_s9 + $0x58] sm:$0xf]  ;;  %p4131_p3 = pnand %p4130_p2, %p4124_p13 }
  0x2b   : > { %3592 = vmatprep.mubr.msk.bf16.mxu0 %vm312_vm1, %v4402_v13  ;;  %v632_v34 = vsel %vm4375_vm4, %v627_v17, %v631_v55  ;;  %v660_v35 = vrot.slane %v658_v60, 4  ;;  %v663_v36 = vrot.slane %v661_v62, 5  ;;  %v667_v32 = vshll.u32 %v4362_v45, 16 }
  0x2c   : > { %v4423_v39 = vcombine.low %v622_v5, %v632_v34  ;;  %v695_v41 = vshrl.u32 %v4370_v51, 16  ;;  %v640_v42 = vor.u32 %v639_v26, %v636_v25  ;;  %v645_v43 = vrot.slane %v643_v28, 5 }
  0x2d   : > { %v664_v47 = vor.u32 %v663_v36, %v660_v35  ;;  %v669_v48 = vrot.slane %v667_v32, 5  ;;  %v673_v49 = vrot.slane %v671_v63, 4  ;;  %v677_v52 = vshll.u32 %v4408_v33, 16 }
  0x2e   : > { %5493 = vst [vmem:[#allocation11_spill] sm:$0xff] %v4423_v39  ;;  %3593 = vmatmul.mubr.msk.bf16.vlgmr.msra.gmra.mrb[0].mxu0 %vm312_vm1, %v4423_v39  ;;  %v641_v55 = vrot.slane %v640_v42, 4  ;;  %v650_v57 = vor.u32 %v649_v29, %v645_v43  ;;  %v655_v58 = vrot.slane %v653_v30, 5  ;;  %v4442_v59 = vcombine.low %v4416_v37, %v4429_v44  ;;  %v4462_v29 = vld [vmem:[%s4282_s9 + $0x44] sm:$0x1] }
  0x2f   : > { %3625 = vmatpush3.bf16.msra.mxu0 %v4335_v22  ;;  %v665_v60 = vrot.slane %v664_v47, 4  ;;  %v674_v61 = vor.u32 %v673_v49, %v669_v48  ;;  %v679_v62 = vrot.slane %v677_v52, 5  ;;  %v706_v63 = vshrl.u32 %v4416_v37, 16 }
  0x30   : > { %3465 = vmatmul.mubr.msk.bf16.gmra.mrb[8].mxu1 %vm312_vm1, %v4390_v0  ;;  %5494 = vst [vmem:[#allocation12_spill] sm:$0xff] %v4442_v59  ;;  %v646_v2 = vsel %vm4375_vm4, %v641_v55, %v645_v43  ;;  %v651_v3 = vrot.slane %v650_v57, 4  ;;  %v709_v5 = vshll.u32 %v4416_v37, 16  ;;  %v4453_v17 = vcombine.low %v4432_v46, %v4436_v54  ;;  %4057 = vmatprep.subr.msk.bf16.mxu0 %vm361_vm0, %v4421_v38  ;;  %v4481_v55 = vld [vmem:[%s4282_s9 + $0x60] sm:$0xf] }
  0x31   : > { %3468 = vmatprep.mubr.msk.bf16.mxu1 %vm312_vm1, %v4442_v59  ;;  %v670_v22 = vsel %vm4375_vm4, %v665_v60, %v669_v48  ;;  %v675_v25 = vrot.slane %v674_v61, 4  ;;  %v719_v26 = vshrl.u32 %v4429_v44, 16  ;;  %v730_v28 = vshrl.u32 %v4432_v46, 16  ;;  %v4473_v48 = vld [vmem:[%s4282_s9 + $0x50] sm:$0x1] }
  0x32   : > { %5495 = vst [vmem:[#allocation13_spill] sm:$0xff] %v4453_v17  ;;  %v656_v30 = vsel %vm4375_vm4, %v651_v3, %v655_v58  ;;  %v733_v34 = vshll.u32 %v4432_v46, 16  ;;  %v684_v35 = vrot.slane %v682_v9, 4  ;;  %v687_v36 = vrot.slane %v685_v20, 5  ;;  %v4484_v57 = vld [vmem:[%s4282_s9 + $0x64] sm:$0xf] }
  0x33   : > { %v4467_v32 = vcombine.low %v646_v2, %v656_v30  ;;  %v680_v42 = vsel %vm4375_vm4, %v675_v25, %v679_v62  ;;  %v691_v43 = vshll.u32 %v4370_v51, 16  ;;  %v697_v47 = vrot.slane %v695_v41, 4  ;;  %v4490_v62 = vld [vmem:[%s4282_s9 + $0x6c] sm:$0xf]  ;;  %v4501_v25 = vld [vmem:[%s4282_s9 + $0x70] sm:$0xf] }
  0x34   : > { %v4475_v49 = vcombine.low %v670_v22, %v680_v42  ;;  %v688_v52 = vor.u32 %v687_v36, %v684_v35  ;;  %v701_v9 = vshll.u32 %v4462_v29, 16  ;;  %v708_v20 = vrot.slane %v706_v63, 4  ;;  %v4554_v59 = vld [vmem:[%s4282_s9 + $0x88] sm:$0xf] }
  0x35   : > { %3596 = vmatprep.mubr.msk.bf16.mxu0 %vm312_vm1, %v4467_v32  ;;  %v693_v41 = vrot.slane %v691_v43, 5  ;;  %v711_v58 = vrot.slane %v709_v5, 5  ;;  %v715_v60 = vshll.u32 %v4429_v44, 16  ;;  %v721_v61 = vrot.slane %v719_v26, 4 }
  0x36   : > { %3597 = vmatmul.mubr.msk.bf16.gmra.mrb[4].mxu0 %vm312_vm1, %v4475_v49  ;;  %v743_v2 = vshrl.u32 %v4436_v54, 16  ;;  %v689_v63 = vrot.slane %v688_v52, 4  ;;  %v725_v3 = vshll.u32 %v4473_v48, 16  ;;  %v4498_v22 = vcombine.low %v4481_v55, %v4484_v57 }
  0x37   : > { %v698_v5 = vor.u32 %v697_v47, %v693_v41  ;;  %v703_v30 = vrot.slane %v701_v9, 5  ;;  %v712_v26 = vor.u32 %v711_v58, %v708_v20  ;;  %v717_v35 = vrot.slane %v715_v60, 5  ;;  %v4514_v9 = vld [vmem:[%s4282_s9 + $0x5c] sm:$0x1] }
  0x38   : > { %3469 = vmatmul.mubr.msk.bf16.gmra.mrb[12].mxu1 %vm312_vm1, %v4453_v17  ;;  %5496 = vst [vmem:[#allocation14_spill] sm:$0xff] %v4498_v22  ;;  %v694_v36 = vsel %vm4375_vm4, %v689_v63, %v693_v41  ;;  %v727_v42 = vrot.slane %v725_v3, 5  ;;  %v754_v43 = vshrl.u32 %v4481_v55, 16  ;;  %v757_v52 = vshll.u32 %v4481_v55, 16  ;;  %v4530_v17 = vld [vmem:[%s4282_s9 + $0x68] sm:$0x1] }
  0x39   : > { %3472 = vmatprep.mubr.msk.bf16.mxu1 %vm312_vm1, %v4498_v22  ;;  %v699_v24 = vrot.slane %v698_v5, 4  ;;  %v713_v23 = vrot.slane %v712_v26, 4  ;;  %v722_v4 = vor.u32 %v721_v61, %v717_v35  ;;  %v4511_v47 = vcombine.low %v4490_v62, %v4501_v25 }
  0x3a   : > { %v571_v20 = vshll.u32 %v4288_v7, 16  ;;  %v575_v41 = vshrl.u32 %v4288_v7, 16  ;;  %v767_v58 = vshrl.u32 %v4484_v57, 16  ;;  %v732_v60 = vrot.slane %v730_v28, 4 }
  0x3b   : > { %5497 = vst [vmem:[#allocation15_spill] sm:$0xff] %v4511_v47  ;;  %v704_v63 = vsel %vm4375_vm4, %v699_v24, %v703_v30  ;;  %v718_v61 = vsel %vm4375_vm4, %v713_v23, %v717_v35  ;;  %v723_v3 = vrot.slane %v722_v4, 4  ;;  %v735_v5 = vrot.slane %v733_v34, 5  ;;  %v4535_v30 = vld [vmem:[%s4282_s9 + $0x78] sm:$0xf] }
  0x3c   : > { %v4523_v26 = vcombine.low %v694_v36, %v704_v63  ;;  %v739_v11 = vshll.u32 %v4436_v54, 16  ;;  %v745_v22 = vrot.slane %v743_v2, 4  ;;  %v749_v28 = vshll.u32 %v4514_v9, 16  ;;  %v4538_v35 = vld [vmem:[%s4282_s9 + $0x7c] sm:$0xf] }
  0x3d   : > { %v728_v24 = vsel %vm4375_vm4, %v723_v3, %v727_v42  ;;  %v736_v23 = vor.u32 %v735_v5, %v732_v60  ;;  %v756_v4 = vrot.slane %v754_v43, 4  ;;  %v759_v34 = vrot.slane %v757_v52, 5  ;;  %v4550_v3 = vld [vmem:[%s4282_s9 + $0x84] sm:$0xf] }
  0x3e   : > { %5498 = vst [vmem:[#allocation16_spill] sm:$0xff] %v4523_v26  ;;  %v5499_v36 = vshrl.u32 %v4285_v6, 16  ;;  %3600 = vmatprep.mubr.msk.bf16.mxu0 %vm312_vm1, %v4523_v26  ;;  %v4546_v2 = vcombine.low %v718_v61, %v728_v24  ;;  %v763_v42 = vshll.u32 %v4484_v57, 16  ;;  %v769_v60 = vrot.slane %v767_v58, 4 }
  0x3f   : > { %v737_v43 = vrot.slane %v736_v23, 4  ;;  %v760_v52 = vor.u32 %v759_v34, %v756_v4  ;;  %v773_v5 = vshll.u32 %v4530_v17, 16  ;;  %v751_v61 = vrot.slane %v749_v28, 5  ;;  %v4574_v28 = vld [vmem:[%s4282_s9 + $0x90] sm:$0xf] }
  0x40   : > { %3473 = vmatmul.mubr.msk.bf16.gmra.mrb[16].mxu1 %vm312_vm1, %v4511_v47  ;;  %v4542_v63 = vrot.slane %v5499_v36, 4  ;;  %5500 = vst [vmem:[#allocation17_spill] sm:$0xff] %v4546_v2  ;;  %v741_v47 = vrot.slane %v739_v11, 5  ;;  %3601 = vmatmul.mubr.msk.bf16.gmra.mrb[8].mxu0 %vm312_vm1, %v4546_v2  ;;  %v765_v24 = vrot.slane %v763_v42, 5  ;;  %v4560_v11 = vcombine.low %v4535_v30, %v4538_v35  ;;  %v4577_v42 = vld [vmem:[%s4282_s9 + $0x94] sm:$0xf] }
  0x41   : > { %v5502_v23 = vshll.u32 %v4285_v6, 16  ;;  %v1274_v58 = vrot.slane %v4308_v14, 5  ;;  %v761_v0 = vrot.slane %v760_v52, 4  ;;  %v775_v16 = vrot.slane %v773_v5, 5 }
  0x42   : > { %v746_v36 = vor.u32 %v745_v22, %v741_v47  ;;  %5501 = vst [vmem:[#allocation18_spill] sm:$0xff] %v4560_v11  ;;  %v742_v34 = vsel %vm4375_vm4, %v737_v43, %v741_v47  ;;  %v770_v27 = vor.u32 %v769_v60, %v765_v24  ;;  %3476 = vmatprep.mubr.msk.bf16.mxu1 %vm312_vm1, %v4560_v11  ;;  %v4579_v14 = vrot.slane %v571_v20, 5 }
  0x43   : > { %v567_v4 = vrot.slane %v5502_v23, 5  ;;  %v4571_v22 = vcombine.low %v4550_v3, %v4554_v59  ;;  %v577_v47 = vrot.slane %v575_v41, 4  ;;  %v1270_v43 = vrot.slane %v4332_v21, 5 }
  0x44   : > { %v747_v56 = vrot.slane %v746_v36, 4  ;;  %v766_v52 = vsel %vm4375_vm4, %v761_v0, %v765_v24  ;;  %v771_v36 = vrot.slane %v770_v27, 4  ;;  %v3137_v20 = vrot.slane %v4291_v8, 9  ;;  %v4607_v27 = vld [vmem:[%s4282_s9 + $0xa0] sm:$0xf] }
  0x45   : > { %5503 = vst [vmem:[#allocation19_spill] sm:$0xff] %v4571_v22  ;;  %v1267_v21 = vrot.slane %v4296_v10, 5  ;;  %v3138_v41 = vrot.slane %v4303_v12, 9  ;;  %v1276_v0 = vrot.slane %v1274_v58, 4  ;;  %v4601_v23 = vcombine.low %v4574_v28, %v4577_v42 }
  0x46   : > { %v752_v5 = vsel %vm4375_vm4, %v747_v56, %v751_v61  ;;  %v4604_v56 = vld [vmem:[%s4282_s9 + $0x9c] sm:$0xf]  ;;  %v1277_v61 = vrot.slane %v4351_v31, 5  ;;  %v776_v8 = vsel %vm4375_vm4, %v771_v36, %v775_v16  ;;  %v4629_v36 = vld [vmem:[%s4282_s9 + $0xa8] sm:$0xf] }
  0x47   : > { %v4597_v24 = vcombine.low %v742_v34, %v752_v5  ;;  %5507 = vst [vmem:[#allocation21_spill] sm:$0xff] %v4601_v23  ;;  %v1268_v10 = vsel %vm4586_vm7, %v3137_v20, %v1267_v21  ;;  %v1269_v12 = vrot.slane %v1267_v21, 4  ;;  %v4616_v34 = vcombine.low %v766_v52, %v776_v8  ;;  %v4632_v20 = vld [vmem:[%s4282_s9 + $0xac] sm:$0xf] }
  0x48   : > { %3477 = vmatmul.mubr.msk.bf16.gmra.mrb[20].mxu1 %vm312_vm1, %v4571_v22  ;;  %v568_v5 = vor.u32 %v567_v4, %v4542_v63  ;;  %v5457_v22 = vrot.slane %v4288_v7, 5  ;;  %v4626_v16 = vcombine.low %v4604_v56, %v4607_v27  ;;  %v578_v52 = vor.u32 %v577_v47, %v4579_v14 }
  0x49   : > { %5506 = vst [vmem:[#allocation20_spill] sm:$0xff] %v4597_v24  ;;  %3604 = vmatprep.mubr.msk.bf16.mxu0 %vm312_vm1, %v4597_v24  ;;  %5508 = vst [vmem:[#allocation22_spill] sm:$0xff] %v4616_v34  ;;  %3480 = vmatprep.mubr.msk.bf16.mxu1 %vm312_vm1, %v4601_v23  ;;  %v1271_v31 = vsel %vm4586_vm7, %v1269_v12, %v1270_v43  ;;  %v3139_v4 = vrot.slane %v4323_v18, 9  ;;  %v1281_v43 = vrot.slane %v4326_v19, 5  ;;  %v1284_v12 = vrot.slane %v4393_v1, 5 }
  0x4a   : > { %5509 = vst [vmem:[#allocation23_spill] sm:$0xff] %v4626_v16  ;;  %3605 = vmatmul.mubr.msk.bf16.gmra.mrb[12].mxu0 %vm312_vm1, %v4616_v34  ;;  %v4637_v63 = vcombine.low %v1268_v10, %v1271_v31  ;;  %v1275_v21 = vsel %vm4586_vm7, %v3138_v41, %v1274_v58  ;;  %v1278_v8 = vsel %vm4586_vm7, %v1276_v0, %v1277_v61  ;;  %v1288_v47 = vrot.slane %v4362_v45, 5  ;;  %v4665_v41 = vld [vmem:[%s4282_s9 + $0xb4] sm:$0xf]  ;;  %v4682_v58 = vld [vmem:[%s4282_s9 + $0x8] sm:$0x1] }
  0x4b   : > { %v1282_v18 = vsel %vm4586_vm7, %v3139_v4, %v1281_v43  ;;  %v1283_v10 = vrot.slane %v1281_v43, 4  ;;  %v4653_v19 = vcombine.low %v4629_v36, %v4632_v20  ;;  %v4658_v1 = vrot.slane %v5457_v22, 4 }
  0x4c   : > { %3626 = vmatprep.mubr.msk.bf16.mxu0 %vm312_vm1, %v4637_v63  ;;  %v2321_v45 = vsel %vm361_vm0, %v4421_v38, 0  ;;  %v4669_v0 = vsel %vm361_vm0, %v4313_v15, 0  ;;  %v569_v61 = vrot.slane %v568_v5, 4  ;;  %v4671_v31 = vcombine.low %v1275_v21, %v1278_v8  ;;  %v4679_v38 = vld [vmem:[%s4282_s9 + $0xb8] sm:$0xf] }
  0x4d   : > { %5510 = vst [vmem:[#allocation24_spill] sm:$0xff] %v4653_v19  ;;  %v1285_v4 = vsel %vm4586_vm7, %v1283_v10, %v1284_v12  ;;  %v3140_v43 = vrot.slane %v4356_v40, 9  ;;  %v579_v22 = vrot.slane %v578_v52, 4  ;;  %v1290_v15 = vrot.slane %v1288_v47, 4 }
  0x4e   : > { %v1291_v5 = vrot.slane %v4408_v33, 5  ;;  %v3141_v8 = vrot.slane %v4367_v50, 9  ;;  %v1295_v12 = vrot.slane %v4370_v51, 5  ;;  %v1298_v40 = vrot.slane %v4462_v29, 5  ;;  %v4701_v33 = vld [vmem:[%s5434_s1 + $0xe] sm:$0x3] }
  0x4f   : > { %v4695_v52 = vcombine.low %v4665_v41, %v4679_v38  ;;  %v1289_v29 = vsel %vm4586_vm7, %v3140_v43, %v1288_v47  ;;  %v1302_v10 = vrot.slane %v4429_v44, 5  ;;  %v574_v51 = vsel %vm4375_vm4, %v569_v61, %v4579_v14 }
  0x50   : > { %3481 = vmatmul.mubr.msk.bf16.gmra.mrb[24].mxu1 %vm312_vm1, %v4626_v16  ;;  %v4684_v16 = vcombine.low %v1282_v18, %v1285_v4  ;;  %v581_v18 = vshll.u32 %v4682_v58, 16  ;;  %v1297_v4 = vrot.slane %v1295_v12, 4  ;;  %v1296_v47 = vsel %vm4586_vm7, %v3141_v8, %v1295_v12 }
  0x51   : > { %3484 = vmatprep.mubr.msk.bf16.mxu1 %vm312_vm1, %v4653_v19  ;;  %5512 = vst [vmem:[#allocation26_spill] sm:$0xff] %v4695_v52  ;;  %v1292_v19 = vsel %vm4586_vm7, %v1290_v15, %v1291_v5  ;;  %v1309_v43 = vrot.slane %v4436_v54, 5  ;;  %v3142_v54 = vrot.slane %v4416_v37, 9  ;;  %v3143_v14 = vrot.slane %v4432_v46, 9  ;;  %v4766_v46 = vld [vmem:[%s4282_s9 + $0x80] sm:$0x1] }
  0x52   : > { %5511 = vst [vmem:[#allocation25_spill] sm:$0xff] %v4684_v16  ;;  %3627 = vmatmul.mubr.msk.bf16.vlgmr.msra.gmra.mrb[0].mxu0 %vm312_vm1, %v4671_v31  ;;  %v583_v50 = vrot.slane %v581_v18, 5  ;;  %v4733_v8 = vcombine.low %v1289_v29, %v1292_v19  ;;  %v1304_v18 = vrot.slane %v1302_v10, 4  ;;  %v1316_v19 = vrot.slane %v4484_v57, 5  ;;  %v4798_v15 = vld [vmem:[%s4282_s9 + $0x98] sm:$0x1] }
  0x53   : > { %3659 = vmatpush3.bf16.msra.mxu0 %v2321_v45  ;;  %3630 = vmatprep.mubr.msk.bf16.mxu0 %vm312_vm1, %v4684_v16  ;;  %v1299_v45 = vsel %vm4586_vm7, %v1297_v4, %v1298_v40  ;;  %v1305_v4 = vrot.slane %v4473_v48, 5  ;;  %v1311_v44 = vrot.slane %v1309_v43, 4  ;;  %v1303_v57 = vsel %vm4586_vm7, %v3142_v54, %v1302_v10  ;;  %v4776_v54 = vld [vmem:[%s5434_s1 + $0x6] sm:$0x3] }
  0x54   : > { %4058 = vmatprep.subr.msk.bf16.mxu0 %vm361_vm0, %v4701_v33  ;;  %v584_v61 = vsel %vm4375_vm4, %v579_v22, %v583_v50  ;;  %5513 = vst [vmem:[#allocation27_spill] sm:$0xff] %v4733_v8  ;;  %v4736_v40 = vcombine.low %v1296_v47, %v1299_v45  ;;  %v1312_v22 = vrot.slane %v4514_v9, 5  ;;  %v1323_v47 = vrot.slane %v4501_v25, 5 }
  0x55   : > { %v3104_v12 = vcombine.low %v574_v51, %v584_v61  ;;  %v1306_v45 = vsel %vm4586_vm7, %v1304_v18, %v1305_v4  ;;  %v1310_v61 = vsel %vm4586_vm7, %v3143_v14, %v1309_v43  ;;  %v1330_v9 = vrot.slane %v4538_v35, 5 }
  0x56   : > { %5514 = vst [vmem:[#allocation28_spill] sm:$0xff] %v4736_v40  ;;  %v1313_v29 = vsel %vm4586_vm7, %v1311_v44, %v1312_v22  ;;  %v3144_v48 = vrot.slane %v4481_v55, 9  ;;  %v1318_v51 = vrot.slane %v1316_v19, 4  ;;  %v1319_v10 = vrot.slane %v4530_v17, 5 }
  0x57   : > { %v3145_v14 = vrot.slane %v4490_v62, 9  ;;  %v3146_v44 = vrot.slane %v4535_v30, 9  ;;  %v1337_v55 = vrot.slane %v4554_v59, 5  ;;  %v4785_v17 = vcombine.low %v1303_v57, %v1306_v45 }
  0x58   : > { %3485 = vmatmul.mubr.msk.bf16.gmra.mrb[28].mxu1 %vm312_vm1, %v4695_v52  ;;  %v1325_v4 = vrot.slane %v1323_v47, 4  ;;  %v4794_v43 = vcombine.low %v1310_v61, %v1313_v29  ;;  %v1332_v50 = vrot.slane %v1330_v9, 4  ;;  %v1333_v37 = vrot.slane %v4766_v46, 5  ;;  %v4815_v52 = vld [vmem:[%s4282_s9 + $0xa4] sm:$0x1] }
  0x59   : > { %3490 = vmatprep.mubr.msk.bf16.mxu1 %vm312_vm1, %v3104_v12  ;;  %v4763_v12 = vld [vmem:[%s4282_s9 + $0x74] sm:$0x1]  ;;  %5515 = vst [vmem:[#allocation29_spill] sm:$0xff] %v4785_v17  ;;  %v1344_v57 = vrot.slane %v4577_v42, 5  ;;  %v1317_v45 = vsel %vm4586_vm7, %v3144_v48, %v1316_v19  ;;  %v1320_v18 = vsel %vm4586_vm7, %v1318_v51, %v1319_v10  ;;  %v1351_v29 = vrot.slane %v4607_v27, 5 }
  0x5a   : > { %3631 = vmatmul.mubr.msk.bf16.gmra.mrb[4].mxu0 %vm312_vm1, %v4733_v8  ;;  %v1326_v22 = vrot.slane %v4763_v12, 5  ;;  %5516 = vst [vmem:[#allocation30_spill] sm:$0xff] %v4794_v43  ;;  %v1324_v61 = vsel %vm4586_vm7, %v3145_v14, %v1323_v47  ;;  %v1331_v5 = vsel %vm4586_vm7, %v3146_v44, %v1330_v9  ;;  %v3147_v21 = vrot.slane %v4550_v3, 9 }
  0x5b   : > { %3634 = vmatprep.mubr.msk.bf16.mxu0 %vm312_vm1, %v4736_v40  ;;  %v3148_v48 = vrot.slane %v4574_v28, 9  ;;  %v1347_v47 = vrot.slane %v4798_v15, 5  ;;  %v1334_v9 = vsel %vm4586_vm7, %v1332_v50, %v1333_v37  ;;  %v1346_v10 = vrot.slane %v1344_v57, 4 }
  0x5c   : > { %v1327_v19 = vsel %vm4586_vm7, %v1325_v4, %v1326_v22  ;;  %v3149_v14 = vrot.slane %v4604_v56, 9  ;;  %v1358_v44 = vrot.slane %v4632_v20, 5  ;;  %v1354_v4 = vrot.slane %v4815_v52, 5  ;;  %v4832_v22 = vld [vmem:[%s4282_s9 + $0xb0] sm:$0x1] }
  0x5d   : > { %v5517_v23 = vshrl.u32 %v4490_v62, 16  ;;  %v5518_v40 = vshll.u32 %v4490_v62, 16  ;;  %v4842_v37 = vcombine.low %v1324_v61, %v1327_v19  ;;  %v1338_v50 = vsel %vm4586_vm7, %v3147_v21, %v1337_v55 }
  0x5e   : > { %v787_v8 = vshll.u32 %v4501_v25, 16  ;;  %v4847_v16 = vcombine.low %v1331_v5, %v1334_v9  ;;  %v1352_v21 = vsel %vm4586_vm7, %v3149_v14, %v1351_v29  ;;  %v1360_v5 = vrot.slane %v1358_v44, 4 }
  0x5f   : > { %v783_v11 = vrot.slane %v5518_v40, 5  ;;  %v3150_v40 = vrot.slane %v4629_v36, 9 }
  0x60   : > { %3491 = vmatmul.mubr.msk.bf16.vlgmr.msra.gmra.mrb[0].mxu1 %vm312_vm1, %v4402_v13  ;;  %v4792_v13 = vld [vmem:[%s4282_s9 + $0x8c] sm:$0x1]  ;;  %v4865_v19 = vrot.slane %v787_v8, 5 }
  0x61   : > { %3494 = vmatprep.mubr.msk.bf16.mxu1 %vm312_vm1, %v4423_v39  ;;  %3523 = vmatpush3.bf16.msra.mxu1 %v4669_v0  ;;  %v1339_v39 = vrot.slane %v1337_v55, 4  ;;  %v1340_v51 = vrot.slane %v4792_v13, 5  ;;  %v1353_v0 = vrot.slane %v1351_v29, 4  ;;  %v1361_v55 = vrot.slane %v4832_v22, 5 }
  0x62   : > { %4053 = vmatprep.subr.msk.bf16.mxu1 %vm361_vm0, %v4776_v54  ;;  %3635 = vmatmul.mubr.msk.bf16.gmra.mrb[8].mxu0 %vm312_vm1, %v4785_v17  ;;  %v780_v17 = vrot.slane %v5517_v23, 4  ;;  %v1345_v23 = vsel %vm4586_vm7, %v3148_v48, %v1344_v57  ;;  %v811_v57 = vshll.u32 %v4538_v35, 16  ;;  %v5521_v29 = vshll.u32 %v4535_v30, 16 }
  0x63   : > { %3638 = vmatprep.mubr.msk.bf16.mxu0 %vm312_vm1, %v4794_v43  ;;  %v4838_v43 = vcombine.low %v1317_v45, %v1320_v18  ;;  %v1341_v62 = vsel %vm4586_vm7, %v1339_v39, %v1340_v51  ;;  %v1348_v18 = vsel %vm4586_vm7, %v1346_v10, %v1347_v47  ;;  %v1355_v45 = vsel %vm4586_vm7, %v1353_v0, %v1354_v4 }
  0x64   : > { %v784_v61 = vor.u32 %v783_v11, %v780_v17  ;;  %v1365_v39 = vrot.slane %v4679_v38, 5  ;;  %v5519_v51 = vshrl.u32 %v4501_v25, 16  ;;  %v5520_v47 = vshrl.u32 %v4535_v30, 16  ;;  %v4880_v17 = vld [vmem:[%s4282_s9 + $0xbc] sm:$0x1] }
  0x65   : > { %v807_v10 = vrot.slane %v5521_v29, 5  ;;  %v4875_v0 = vcombine.low %v1338_v50, %v1341_v62  ;;  %v4877_v11 = vcombine.low %v1345_v23, %v1348_v18  ;;  %v4882_v8 = vrot.slane %v811_v57, 5  ;;  %v4912_v29 = vld [vmem:[%s4282_s9 + $0xc0] sm:$0xf] }
  0x66   : > { %v793_v48 = vrot.slane %v5519_v51, 4  ;;  %v804_v9 = vrot.slane %v5520_v47, 4  ;;  %v5522_v25 = vshrl.u32 %v4538_v35, 16  ;;  %v4888_v4 = vcombine.low %v1352_v21, %v1355_v45 }
  0x67   : > { %v1359_v30 = vsel %vm4586_vm7, %v3150_v40, %v1358_v44  ;;  %v797_v50 = vshll.u32 %v4763_v12, 16  ;;  %v3151_v62 = vrot.slane %v4665_v41, 9  ;;  %v1362_v23 = vsel %vm4586_vm7, %v1360_v5, %v1361_v55 }
  0x68   : > { %3495 = vmatmul.mubr.msk.bf16.gmra.mrb[4].mxu1 %vm312_vm1, %v4467_v32  ;;  %v817_v14 = vrot.slane %v5522_v25, 4  ;;  %v785_v18 = vrot.slane %v784_v61, 4  ;;  %v1367_v57 = vrot.slane %v1365_v39, 4  ;;  %v835_v35 = vshll.u32 %v4554_v59, 16 }
  0x69   : > { %3498 = vmatprep.mubr.msk.bf16.mxu1 %vm312_vm1, %v4475_v49  ;;  %v794_v21 = vor.u32 %v793_v48, %v4865_v19  ;;  %v1368_v45 = vrot.slane %v4880_v17, 5  ;;  %v808_v44 = vor.u32 %v807_v10, %v804_v9  ;;  %v821_v12 = vshll.u32 %v4766_v46, 16 }
  0x6a   : > { %3639 = vmatmul.mubr.msk.bf16.gmra.mrb[12].mxu0 %vm312_vm1, %v4838_v43  ;;  %v818_v40 = vor.u32 %v817_v14, %v4882_v8  ;;  %v5523_v5 = vshrl.u32 %v4550_v3, 16  ;;  %v5524_v61 = vshll.u32 %v4550_v3, 16  ;;  %v5525_v47 = vshrl.u32 %v4554_v59, 16 }
  0x6b   : > { %3642 = vmatprep.mubr.msk.bf16.mxu0 %vm312_vm1, %v4842_v37  ;;  %v4914_v9 = vrot.slane %v835_v35, 5  ;;  %v5526_v46 = vshrl.u32 %v4574_v28, 16  ;;  %v5527_v25 = vshll.u32 %v4574_v28, 16  ;;  %v799_v3 = vrot.slane %v797_v50, 5 }
  0x6c   : > { %v828_v55 = vrot.slane %v5523_v5, 4  ;;  %v831_v51 = vrot.slane %v5524_v61, 5  ;;  %v841_v48 = vrot.slane %v5525_v47, 4  ;;  %v4921_v5 = vcombine.low %v1359_v30, %v1362_v23 }
  0x6d   : > { %v852_v10 = vrot.slane %v5526_v46, 4  ;;  %v855_v14 = vrot.slane %v5527_v25, 5  ;;  %v1366_v59 = vsel %vm4586_vm7, %v3151_v62, %v1365_v39  ;;  %v5528_v61 = vshrl.u32 %v4577_v42, 16  ;;  %v4931_v46 = vld [vmem:[%s4282_s9 + $0xc4] sm:$0xf] }
  0x6e   : > { %v790_v35 = vsel %vm4375_vm4, %v785_v18, %v4865_v19  ;;  %v809_v28 = vrot.slane %v808_v44, 4  ;;  %v1369_v30 = vsel %vm4586_vm7, %v1367_v57, %v1368_v45  ;;  %v4940_v39 = vld [vmem:[%s4282_s9 + $0xc8] sm:$0x1]  ;;  %v832_v50 = vor.u32 %v831_v51, %v828_v55 }
  0x6f   : > { %v865_v47 = vrot.slane %v5528_v61, 4  ;;  %v845_v62 = vshll.u32 %v4792_v13, 16  ;;  %v819_v19 = vrot.slane %v818_v40, 4  ;;  %v823_v23 = vrot.slane %v821_v12, 5 }
  0x70   : > { %3499 = vmatmul.mubr.msk.bf16.gmra.mrb[8].mxu1 %vm312_vm1, %v4523_v26  ;;  %v795_v26 = vrot.slane %v794_v21, 4  ;;  %v856_v18 = vor.u32 %v855_v14, %v852_v10  ;;  %v2101_v21 = vrot.slane %v4931_v46, 5  ;;  %v869_v57 = vshll.u32 %v4798_v15, 16 }
  0x71   : > { %3502 = vmatprep.mubr.msk.bf16.mxu1 %vm312_vm1, %v4546_v2  ;;  %v859_v2 = vshll.u32 %v4577_v42, 16  ;;  %v3221_v42 = vrot.slane %v4912_v29, 9  ;;  %v883_v45 = vshll.u32 %v4607_v27, 16  ;;  %v4955_v55 = vcombine.low %v1366_v59, %v1369_v30 }
  0x72   : > { %3643 = vmatmul.mubr.msk.bf16.gmra.mrb[16].mxu0 %vm312_vm1, %v4847_v16  ;;  %v800_v13 = vsel %vm4375_vm4, %v795_v26, %v799_v3  ;;  %v2104_v12 = vrot.slane %v4940_v39, 5  ;;  %v814_v40 = vsel %vm4375_vm4, %v809_v28, %v4882_v8  ;;  %v833_v15 = vrot.slane %v832_v50, 4 }
  0x73   : > { %v4933_v25 = vrot.slane %v859_v2, 5  ;;  %3646 = vmatprep.mubr.msk.bf16.mxu0 %vm312_vm1, %v4875_v0  ;;  %v842_v2 = vor.u32 %v841_v48, %v4914_v9  ;;  %v847_v51 = vrot.slane %v845_v62, 5  ;;  %v5529_v48 = vshrl.u32 %v4604_v56, 16 }
  0x74   : > { %v5530_v14 = vshll.u32 %v4604_v56, 16  ;;  %v824_v26 = vsel %vm4375_vm4, %v819_v19, %v823_v23  ;;  %v857_v59 = vrot.slane %v856_v18, 4  ;;  %v871_v8 = vrot.slane %v869_v57, 5 }
  0x75   : > { %v866_v44 = vor.u32 %v865_v47, %v4933_v25  ;;  %v876_v10 = vrot.slane %v5529_v48, 4  ;;  %v843_v3 = vrot.slane %v842_v2, 4  ;;  %v907_v47 = vshll.u32 %v4632_v20, 16 }
  0x76   : > { %v879_v61 = vrot.slane %v5530_v14, 5  ;;  %v4970_v28 = vrot.slane %v883_v45, 5  ;;  %v5531_v50 = vshrl.u32 %v4607_v27, 16  ;;  %v2103_v48 = vrot.slane %v2101_v21, 4 }
  0x77   : > { %v867_v30 = vrot.slane %v866_v44, 4  ;;  %v5532_v56 = vshrl.u32 %v4629_v36, 16  ;;  %v4982_v23 = vcombine.low %v814_v40, %v824_v26  ;;  %v838_v2 = vsel %vm4375_vm4, %v833_v15, %v4914_v9 }
  0x78   : > { %3503 = vmatmul.mubr.msk.bf16.gmra.mrb[12].mxu1 %vm312_vm1, %v4597_v24  ;;  %v889_v62 = vrot.slane %v5531_v50, 4  ;;  %v5533_v24 = vshll.u32 %v4629_v36, 16  ;;  %v880_v27 = vor.u32 %v879_v61, %v876_v10  ;;  %v848_v18 = vsel %vm4375_vm4, %v843_v3, %v847_v51 }
  0x79   : > { %3506 = vmatprep.mubr.msk.bf16.mxu1 %vm312_vm1, %v4616_v34  ;;  %v4974_v34 = vcombine.low %v790_v35, %v800_v13  ;;  %v900_v14 = vrot.slane %v5532_v56, 4  ;;  %v893_v35 = vshll.u32 %v4815_v52, 16  ;;  %v909_v36 = vrot.slane %v907_v47, 5 }
  0x7a   : > { %v903_v19 = vrot.slane %v5533_v24, 5  ;;  %3647 = vmatmul.mubr.msk.bf16.gmra.mrb[20].mxu0 %vm312_vm1, %v4877_v11  ;;  %v5534_v24 = vshrl.u32 %v4632_v20, 16  ;;  %v5535_v57 = vrot.slane %v4288_v7, 5  ;;  %v5536_v45 = vrot.slane %v4285_v6, 9 }
  0x7b   : > { %3650 = vmatprep.mubr.msk.bf16.mxu0 %vm312_vm1, %v4888_v4  ;;  %v862_v52 = vsel %vm4375_vm4, %v857_v59, %v4933_v25  ;;  %v872_v13 = vsel %vm4375_vm4, %v867_v30, %v871_v8  ;;  %v890_v40 = vor.u32 %v889_v62, %v4970_v28  ;;  %v917_v20 = vshll.u32 %v4832_v22, 16 }
  0x7c   : > { %v913_v44 = vrot.slane %v5534_v24, 4  ;;  %v5000_v9 = vsel %vm4586_vm7, %v5536_v45, %v5535_v57  ;;  %v2102_v6 = vsel %vm4586_vm7, %v3221_v42, %v2101_v21  ;;  %v2105_v7 = vsel %vm4586_vm7, %v2103_v48, %v2104_v12 }
  0x7d   : > { %v904_v15 = vor.u32 %v903_v19, %v900_v14  ;;  %v1263_v51 = vrot.slane %v4682_v58, 5  ;;  %v5018_v25 = vcombine.low %v838_v2, %v848_v18  ;;  %v881_v10 = vrot.slane %v880_v27, 4 }
  0x7e   : > { %v895_v61 = vrot.slane %v893_v35, 5  ;;  %v931_v22 = vshll.u32 %v4679_v38, 16  ;;  %v5021_v26 = vcombine.low %v862_v52, %v872_v13  ;;  %v914_v3 = vor.u32 %v913_v44, %v909_v36 }
  0x7f   : > { %v5537_v42 = vshrl.u32 %v4665_v41, 16  ;;  %v1264_v12 = vsel %vm4586_vm7, %v4658_v1, %v1263_v51  ;;  %v891_v58 = vrot.slane %v890_v40, 4  ;;  %v919_v59 = vrot.slane %v917_v20, 5 }
  0x80   : > { %3507 = vmatmul.mubr.msk.bf16.gmra.mrb[16].mxu1 %vm312_vm1, %v4974_v34  ;;  %v5538_v47 = vshll.u32 %v4665_v41, 16  ;;  %v3153_v8 = vcombine.low %v5000_v9, %v1264_v12  ;;  %v905_v50 = vrot.slane %v904_v15, 4  ;;  %v1871_v62 = vshrl.u32 %v4912_v29, 16 }
  0x81   : > { %3510 = vmatprep.mubr.msk.bf16.mxu1 %vm312_vm1, %v4982_v23  ;;  %v924_v21 = vrot.slane %v5537_v42, 4  ;;  %v1874_v48 = vshll.u32 %v4912_v29, 16  ;;  %v1880_v56 = vshll.u32 %v4931_v46, 16  ;;  %v933_v14 = vrot.slane %v931_v22, 5  ;;  %v5540_v42 = vld [vmem:[#allocation7_spill] sm:$0xff] }
  0x82   : > { %v927_v30 = vrot.slane %v5538_v47, 5  ;;  %3651 = vmatmul.mubr.msk.bf16.gmra.mrb[24].mxu0 %vm312_vm1, %v4921_v5  ;;  %v5539_v1 = vshrl.u32 %v4679_v38, 16  ;;  %v1884_v2 = vshrl.u32 %v4931_v46, 16  ;;  %v1890_v41 = vshll.u32 %v4940_v39, 16 }
  0x83   : > { %3654 = vmatprep.mubr.msk.bf16.mxu0 %vm312_vm1, %v4955_v55  ;;  %v915_v27 = vrot.slane %v914_v3, 4  ;;  %v1873_v35 = vrot.slane %v1871_v62, 4  ;;  %v1876_v18 = vrot.slane %v1874_v48, 5  ;;  %v1882_v24 = vrot.slane %v1880_v56, 5  ;;  %v5542_v62 = vld [vmem:[#allocation9_spill] sm:$0xff]  ;;  %v5544_v48 = vld [vmem:[#allocation12_spill] sm:$0xff] }
  0x84   : > { %v937_v19 = vrot.slane %v5539_v1, 4  ;;  %v5042_v44 = vcombine.low %v2102_v6, %v2105_v7  ;;  %v1886_v57 = vrot.slane %v1884_v2, 4  ;;  %v886_v38 = vsel %vm4375_vm4, %v881_v10, %v4970_v28  ;;  %v5546_v1 = vld [vmem:[#allocation14_spill] sm:$0xff] }
  0x85   : > { %v896_v39 = vsel %vm4375_vm4, %v891_v58, %v895_v61  ;;  %v941_v45 = vshll.u32 %v4880_v17, 16  ;;  %v1877_v9 = vor.u32 %v1876_v18, %v1873_v35  ;;  %v928_v52 = vor.u32 %v927_v30, %v924_v21  ;;  %v3277_v30 = vld [vmem:[%s5434_s1 + $0x10] sm:$0x3]  ;;  %v5550_v2 = vld [vmem:[#allocation18_spill] sm:$0xff]  ;;  %v5553_v35 = vld [vmem:[#allocation19_spill] sm:$0xff] }
  0x86   : > { %v938_v13 = vor.u32 %v937_v19, %v933_v14  ;;  %v1887_v40 = vor.u32 %v1886_v57, %v1882_v24  ;;  %v1892_v20 = vrot.slane %v1890_v41, 5  ;;  %v910_v6 = vsel %vm4375_vm4, %v905_v50, %v909_v36  ;;  %v5541_v50 = vld [vmem:[#allocation8_spill] sm:$0xff]  ;;  %v5549_v19 = vld [vmem:[#allocation15_spill] sm:$0xff]  ;;  %v5554_v18 = vld [vmem:[#allocation21_spill] sm:$0xff] }
  0x87   : > { %v920_v7 = vsel %vm4375_vm4, %v915_v27, %v919_v59  ;;  %v1878_v28 = vrot.slane %v1877_v9, 4  ;;  %v5058_v51 = vcombine.low %v886_v38, %v896_v39  ;;  %v943_v10 = vrot.slane %v941_v45, 5  ;;  %v5551_v41 = vld [vmem:[#allocation28_spill] sm:$0xff]  ;;  %v5552_v27 = vld [vmem:[#allocation29_spill] sm:$0xff]  ;;  %v5556_v57 = vld [vmem:[#allocation23_spill] sm:$0xff] }
  0x88   : > { %3511 = vmatmul.mubr.msk.bf16.gmra.mrb[20].mxu1 %vm312_vm1, %v5018_v25  ;;  %v1888_v15 = vrot.slane %v1887_v40, 4  ;;  %v5064_v61 = vcombine.low %v910_v6, %v920_v7  ;;  %v929_v22 = vrot.slane %v928_v52, 4  ;;  %v939_v3 = vrot.slane %v938_v13, 4  ;;  %v5557_v38 = vld [vmem:[#allocation24_spill] sm:$0xff]  ;;  %v5558_v45 = vld [vmem:[#allocation26_spill] sm:$0xff]  ;;  %v5562_v6 = vld [vmem:[#allocation17_spill] sm:$0xff] }
  0x89   : > { %3514 = vmatprep.mubr.msk.bf16.mxu1 %vm312_vm1, %v5021_v26  ;;  %v1883_v17 = vsel %vm4375_vm4, %v1878_v28, %v1882_v24  ;;  %v2549_v59 = vsel %vm361_vm0, %v4701_v33, 0  ;;  %v5543_v33 = vld [vmem:[#allocation10_spill] sm:$0xff]  ;;  %v1675_v56 = vsel %vm361_vm0, %v4776_v54, 0  ;;  %v5547_v54 = vld [vmem:[#allocation25_spill] sm:$0xff]  ;;  %v5143_v39 = vcombine.low %v4912_v29, %v4931_v46  ;;  %v5150_v9 = vld [vmem:[%s4282_s9 + $0xcc] sm:$0xf] }
  0x8a   : > { %3655 = vmatmul.mubr.msk.bf16.gmra.mrb[28].mxu0 %vm312_vm1, %v5042_v44  ;;  %v1893_v36 = vsel %vm4375_vm4, %v1888_v15, %v1892_v20  ;;  %v934_v12 = vsel %vm4375_vm4, %v929_v22, %v933_v14  ;;  %v944_v58 = vsel %vm4375_vm4, %v939_v3, %v943_v10  ;;  %v5545_v14 = vld [vmem:[#allocation13_spill] sm:$0xff]  ;;  %v5555_v24 = vld [vmem:[#allocation30_spill] sm:$0xff]  ;;  %v5559_v29 = vld [vmem:[#allocation11_spill] sm:$0xff]  ;;  %v2761_v46 = vsel %vm361_vm0, %v3277_v30, 0 }
  0x8b   : > { %3660 = vmatprep.mubr.msk.bf16.mxu0 %vm312_vm1, %v5540_v42  ;;  %v5070_v21 = vcombine.low %v1883_v17, %v1893_v36  ;;  %v5082_v47 = vcombine.low %v934_v12, %v944_v58  ;;  %v5153_v52 = vld [vmem:[%s4282_s9 + $0xd0] sm:$0xf]  ;;  %v5560_v40 = vld [vmem:[#allocation6_spill] sm:$0xff]  ;;  %v5561_v20 = vld [vmem:[#allocation16_spill] sm:$0xff]  ;;  %v2517_v28 = vshrl.u32 %v5150_v9, 16  ;;  %v2520_v15 = vshll.u32 %v5150_v9, 16 }
  0x8c   : > { %v3241_v13 = vcombine.low %v5150_v9, %v5153_v52  ;;  %v5565_v7 = vld [vmem:[#allocation22_spill] sm:$0xff]  ;;  %v2530_v10 = vshrl.u32 %v5153_v52, 16  ;;  %v2526_v17 = vshll.u32 %v5153_v52, 16  ;;  %v223_v12 = vld [vmem:[%s4282_s9 + $0xd4] sm:$0x1]  ;;  %v2747_v53 = vrot.slane %v5153_v52, 5 }
  0x8d   : > { %v2519_v22 = vrot.slane %v2517_v28, 4  ;;  %v2522_v3 = vrot.slane %v2520_v15, 5  ;;  %s3300_s9 = sshll.u32 %s4229_s16, 12  ;;  %s5392_s16 = scalar_lea.sflag [#allocation3], %s161_s4 }
  0x8e   : > { %v2528_v36 = vrot.slane %v2526_v17, 5  ;;  %s5383_s19 = scalar_lea.hbm %s5436_s3, %s3300_s9 }
  0x8f   : > { %v2523_v58 = vor.u32 %v2522_v3, %v2519_v22 }
  0x90   : > { %3515 = vmatmul.mubr.msk.bf16.gmra.mrb[24].mxu1 %vm312_vm1, %v5058_v51 }
  0x91   : > { %3518 = vmatprep.mubr.msk.bf16.mxu1 %vm312_vm1, %v5064_v61 }
  0x92   : > { %3661 = vmatmul.mubr.msk.bf16.vlgmr.msra.gmra.mrb[0].mxu0 %vm312_vm1, %v5541_v50 }
  0x93   : > { %3693 = vmatpush3.bf16.msra.mxu0 %v2549_v59  ;;  %3664 = vmatprep.mubr.msk.bf16.mxu0 %vm312_vm1, %v5542_v62 }
  0x94   : > { %4059 = vmatprep.subr.msk.bf16.mxu0 %vm361_vm0, %v3277_v30  ;;  %v2536_v30 = vshll.u32 %v223_v12, 16 }
  0x98   : > { %3519 = vmatmul.mubr.msk.bf16.gmra.mrb[28].mxu1 %vm312_vm1, %v5082_v47 }
  0x99   : > { %3524 = vmatprep.mubr.msk.bf16.mxu1 %vm312_vm1, %v3153_v8  ;;  %v4120_v8 = vld [vmem:[%s5434_s1 + $0x8] sm:$0x3] }
  0x9a   : > { %3665 = vmatmul.mubr.msk.bf16.gmra.mrb[4].mxu0 %vm312_vm1, %v5543_v33 }
  0x9b   : > { %3668 = vmatprep.mubr.msk.bf16.mxu0 %vm312_vm1, %v5544_v48 }
  0xa0   : > { %3525 = vmatmul.mubr.msk.bf16.vlgmr.msra.gmra.mrb[0].mxu1 %vm312_vm1, %v4637_v63  ;;  %v5548_v63 = vld [vmem:[#allocation27_spill] sm:$0xff] }
  0xa1   : > { %3528 = vmatprep.mubr.msk.bf16.mxu1 %vm312_vm1, %v4671_v31  ;;  %3557 = vmatpush3.bf16.msra.mxu1 %v1675_v56 }
  0xa2   : > { %4055 = vmatprep.subr.msk.bf16.mxu1 %vm361_vm0, %v4120_v8  ;;  %3669 = vmatmul.mubr.msk.bf16.gmra.mrb[8].mxu0 %vm312_vm1, %v5545_v14 }
  0xa3   : > { %3672 = vmatprep.mubr.msk.bf16.mxu0 %vm312_vm1, %v5546_v1 }
  0xa8   : > { %3529 = vmatmul.mubr.msk.bf16.gmra.mrb[4].mxu1 %vm312_vm1, %v5547_v54 }
  0xa9   : > { %3532 = vmatprep.mubr.msk.bf16.mxu1 %vm312_vm1, %v5548_v63 }
  0xaa   : > { %3673 = vmatmul.mubr.msk.bf16.gmra.mrb[12].mxu0 %vm312_vm1, %v5549_v19 }
  0xab   : > { %3676 = vmatprep.mubr.msk.bf16.mxu0 %vm312_vm1, %v5550_v2 }
  0xb0   : > { %3533 = vmatmul.mubr.msk.bf16.gmra.mrb[8].mxu1 %vm312_vm1, %v5551_v41 }
  0xb1   : > { %3536 = vmatprep.mubr.msk.bf16.mxu1 %vm312_vm1, %v5552_v27 }
  0xb2   : > { %3677 = vmatmul.mubr.msk.bf16.gmra.mrb[16].mxu0 %vm312_vm1, %v5553_v35 }
  0xb3   : > { %3680 = vmatprep.mubr.msk.bf16.mxu0 %vm312_vm1, %v5554_v18 }
  0xb8   : > { %3537 = vmatmul.mubr.msk.bf16.gmra.mrb[12].mxu1 %vm312_vm1, %v5555_v24 }
  0xb9   : > { %3540 = vmatprep.mubr.msk.bf16.mxu1 %vm312_vm1, %v4838_v43 }
  0xba   : > { %3681 = vmatmul.mubr.msk.bf16.gmra.mrb[20].mxu0 %vm312_vm1, %v5556_v57 }
  0xbb   : > { %3684 = vmatprep.mubr.msk.bf16.mxu0 %vm312_vm1, %v5557_v38 }
  0xc0   : > { %3541 = vmatmul.mubr.msk.bf16.gmra.mrb[16].mxu1 %vm312_vm1, %v4842_v37 }
  0xc1   : > { %3544 = vmatprep.mubr.msk.bf16.mxu1 %vm312_vm1, %v4847_v16 }
  0xc2   : > { %3685 = vmatmul.mubr.msk.bf16.gmra.mrb[24].mxu0 %vm312_vm1, %v5558_v45 }
  0xc3   : > { %3688 = vmatprep.mubr.msk.bf16.mxu0 %vm312_vm1, %v5143_v39 }
  0xc8   : > { %3545 = vmatmul.mubr.msk.bf16.gmra.mrb[20].mxu1 %vm312_vm1, %v4875_v0 }
  0xc9   : > { %3548 = vmatprep.mubr.msk.bf16.mxu1 %vm312_vm1, %v4877_v11 }
  0xca   : > { %3689 = vmatmul.mubr.msk.bf16.gmra.mrb[28].mxu0 %vm312_vm1, %v3241_v13 }
  0xcb   : > { %3694 = vmatprep.mubr.msk.bf16.mxu0 %vm312_vm1, %v5559_v29 }
  0xd0   : > { %3549 = vmatmul.mubr.msk.bf16.gmra.mrb[24].mxu1 %vm312_vm1, %v4888_v4 }
  0xd1   : > { %3552 = vmatprep.mubr.msk.bf16.mxu1 %vm312_vm1, %v4921_v5 }
  0xd2   : > { %3695 = vmatmul.mubr.msk.bf16.vlgmr.msra.gmra.mrb[0].mxu0 %vm312_vm1, %v4467_v32  ;;  %v5563_v32 = vld [vmem:[#allocation5_spill] sm:$0xff] }
  0xd3   : > { %3727 = vmatpush3.bf16.msra.mxu0 %v2761_v46  ;;  %3698 = vmatprep.mubr.msk.bf16.mxu0 %vm312_vm1, %v4475_v49  ;;  %v5564_v49 = vld [vmem:[#allocation20_spill] sm:$0xff] }
  0xd8   : > { %3553 = vmatmul.mubr.msk.bf16.gmra.mrb[28].mxu1 %vm312_vm1, %v4955_v55 }
  0xd9   : > { %3558 = vmatprep.mubr.msk.bf16.mxu1 %vm312_vm1, %v5560_v40 }
  0xda   : > { %3699 = vmatmul.mubr.msk.bf16.gmra.mrb[4].mxu0 %vm312_vm1, %v5561_v20 }
  0xdb   : > { %3702 = vmatprep.mubr.msk.bf16.mxu0 %vm312_vm1, %v5562_v6 }
  0xe0   : > { %3559 = vmatmul.mubr.msk.bf16.vlgmr.msra.gmra.mrb[0].mxu1 %vm312_vm1, %v5540_v42  ;;  %v2532_v42 = vrot.slane %v2530_v10, 4 }
  0xe1   : > { %3562 = vmatprep.mubr.msk.bf16.mxu1 %vm312_vm1, %v5541_v50  ;;  %3761 = vmatpush3.bf16.msra.mxu1 %v5563_v32  ;;  %v2524_v50 = vrot.slane %v2523_v58, 4 }
  0xe2   : > { %3703 = vmatmul.mubr.msk.bf16.gmra.mrb[8].mxu0 %vm312_vm1, %v5564_v49  ;;  %v2533_v59 = vor.u32 %v2532_v42, %v2528_v36 }
  0xe3   : > { %3706 = vmatprep.mubr.msk.bf16.mxu0 %vm312_vm1, %v5565_v7 }
  0xe8   : > { %3563 = vmatmul.mubr.msk.bf16.gmra.mrb[4].mxu1 %vm312_vm1, %v5542_v62  ;;  %v2534_v62 = vrot.slane %v2533_v59, 4 }
  0xe9   : > { %3566 = vmatprep.mubr.msk.bf16.mxu1 %vm312_vm1, %v5543_v33  ;;  %v2538_v33 = vrot.slane %v2536_v30, 5 }
  0xea   : > { %3707 = vmatmul.mubr.msk.bf16.gmra.mrb[12].mxu0 %vm312_vm1, %v4974_v34 }
  0xeb   : > { %3710 = vmatprep.mubr.msk.bf16.mxu0 %vm312_vm1, %v4982_v23  ;;  %v2539_v56 = vsel %vm4375_vm4, %v2534_v62, %v2538_v33 }
  0xf0   : > { %3567 = vmatmul.mubr.msk.bf16.gmra.mrb[8].mxu1 %vm312_vm1, %v5544_v48  ;;  %v2529_v48 = vsel %vm4375_vm4, %v2524_v50, %v2528_v36 }
  0xf1   : > { %3570 = vmatprep.mubr.msk.bf16.mxu1 %vm312_vm1, %v5545_v14  ;;  %v3259_v8 = vcombine.low %v2529_v48, %v2539_v56 }
  0xf2   : > { %3711 = vmatmul.mubr.msk.bf16.gmra.mrb[16].mxu0 %vm312_vm1, %v5018_v25 }
  0xf3   : > { %3714 = vmatprep.mubr.msk.bf16.mxu0 %vm312_vm1, %v5021_v26 }
  0xf8   : > { %3571 = vmatmul.mubr.msk.bf16.gmra.mrb[12].mxu1 %vm312_vm1, %v5546_v1 }
  0xf9   : > { %3574 = vmatprep.mubr.msk.bf16.mxu1 %vm312_vm1, %v5549_v19 }
  0xfa   : > { %3715 = vmatmul.mubr.msk.bf16.gmra.mrb[20].mxu0 %vm312_vm1, %v5058_v51 }
  0xfb   : > { %3718 = vmatprep.mubr.msk.bf16.mxu0 %vm312_vm1, %v5064_v61 }
 0x100   : > { %3575 = vmatmul.mubr.msk.bf16.gmra.mrb[16].mxu1 %vm312_vm1, %v5550_v2 }
 0x101   : > { %3578 = vmatprep.mubr.msk.bf16.mxu1 %vm312_vm1, %v5553_v35 }
 0x102   : > { %3719 = vmatmul.mubr.msk.bf16.gmra.mrb[24].mxu0 %vm312_vm1, %v5082_v47 }
 0x103   : > { %3722 = vmatprep.mubr.msk.bf16.mxu0 %vm312_vm1, %v5070_v21 }
 0x108   : > { %3579 = vmatmul.mubr.msk.bf16.gmra.mrb[20].mxu1 %vm312_vm1, %v5554_v18 }
 0x109   : > { %3582 = vmatprep.mubr.msk.bf16.mxu1 %vm312_vm1, %v5556_v57 }
 0x10a   : > { %3723 = vmatmul.mubr.msk.bf16.gmra.mrb[28].mxu0 %vm312_vm1, %v3259_v8 }
 0x10b   : > { %3728 = vmatprep.mubr.msk.bf16.mxu0 %vm312_vm1, %v4671_v31  ;;  %v2750_v31 = vrot.slane %v223_v12, 5 }
 0x110   : > { %3583 = vmatmul.mubr.msk.bf16.gmra.mrb[24].mxu1 %vm312_vm1, %v5557_v38 }
 0x111   : > { %3586 = vmatprep.mubr.msk.bf16.mxu1 %vm312_vm1, %v5558_v45 }
 0x112   : > { %3729 = vmatmul.mubr.msk.bf16.vlgmr.msra.gmra.mrb[0].mxu0 %vm312_vm1, %v5547_v54 }
 0x113   : > { %3732 = vmatprep.mubr.msk.bf16.mxu0 %vm312_vm1, %v5548_v63  ;;  %v5307_v63 = vld [vmem:[%s5435_s2] ss:$0 sm:$0xff] }
 0x118   : > { %3587 = vmatmul.mubr.msk.bf16.gmra.mrb[28].mxu1 %vm312_vm1, %v5143_v39 }
 0x119   : > { %3608 = vmatprep.mubr.msk.bf16.mxu1 %vm312_vm1, %v4974_v34  ;;  %v3276_v34 = vrot.slane %v5150_v9, 9 }
 0x11a   : > { %3733 = vmatmul.mubr.msk.bf16.gmra.mrb[4].mxu0 %vm312_vm1, %v5551_v41 }
 0x11b   : > { %3736 = vmatprep.mubr.msk.bf16.mxu0 %vm312_vm1, %v5552_v27 }
 0x120   : > { %3609 = vmatmul.mubr.msk.bf16.vlgmr.msra.gmra.mrb[16].mxu1 %vm312_vm1, %v4982_v23 }
 0x121   : > { %3612 = vmatprep.mubr.msk.bf16.mxu1 %vm312_vm1, %v5018_v25 }
 0x122   : > { %3737 = vmatmul.mubr.msk.bf16.gmra.mrb[8].mxu0 %vm312_vm1, %v5555_v24 }
 0x123   : > { %3740 = vmatprep.mubr.msk.bf16.mxu0 %vm312_vm1, %v4838_v43  ;;  %v2748_v43 = vsel %vm4586_vm7, %v3276_v34, %v2747_v53 }
 0x128   : > { %3613 = vmatmul.mubr.msk.bf16.gmra.mrb[20].mxu1 %vm312_vm1, %v5021_v26 }
 0x129   : > { %3616 = vmatprep.mubr.msk.bf16.mxu1 %vm312_vm1, %v5058_v51 }
 0x12a   : > { %3741 = vmatmul.mubr.msk.bf16.gmra.mrb[12].mxu0 %vm312_vm1, %v4842_v37 }
 0x12b   : > { %3744 = vmatprep.mubr.msk.bf16.mxu0 %vm312_vm1, %v4847_v16  ;;  %v2749_v16 = vrot.slane %v2747_v53, 4 }
 0x12d   : > { %v2751_v37 = vsel %vm4586_vm7, %v2749_v16, %v2750_v31 }
 0x130   : > { %3617 = vmatmul.mubr.msk.bf16.gmra.mrb[24].mxu1 %vm312_vm1, %v5064_v61 }
 0x131   : > { %3620 = vmatprep.mubr.msk.bf16.mxu1 %vm312_vm1, %v5082_v47 }
 0x132   : > { %3745 = vmatmul.mubr.msk.bf16.gmra.mrb[16].mxu0 %vm312_vm1, %v4875_v0  ;;  %v3278_v0 = vcombine.low %v2748_v43, %v2751_v37 }
 0x133   : > { %3748 = vmatprep.mubr.msk.bf16.mxu0 %vm312_vm1, %v4877_v11 }
 0x138   : > { %3621 = vmatmul.mubr.msk.bf16.gmra.mrb[28].mxu1 %vm312_vm1, %v5070_v21 }
 0x13a   : > { %3749 = vmatmul.mubr.msk.bf16.gmra.mrb[20].mxu0 %vm312_vm1, %v4888_v4 }
 0x13b   : > { %3752 = vmatprep.mubr.msk.bf16.mxu0 %vm312_vm1, %v4921_v5 }
 0x142   : > { %3753 = vmatmul.mubr.msk.bf16.gmra.mrb[24].mxu0 %vm312_vm1, %v4955_v55 }
 0x143   : > { %3756 = vmatprep.mubr.msk.bf16.mxu0 %vm312_vm1, %v5042_v44 }
 0x14a   : > { %3757 = vmatmul.mubr.msk.bf16.gmra.mrb[28].mxu0 %vm312_vm1, %v3278_v0 }
 0x1b3   : > { %v3560_v11 = vpop.f32.mrb[0].mxu1 }
 0x1b4   : > { %v1711_v4 = vpop.f32.mrb[1].mxu1  ;;  %v3762_v19 = vadd.f32 %v3560_v11, %v5307_v63 }
 0x1b5   : > { %v3561_v5 = vpop.f32.mrb[2].mxu1  ;;  %v3764_v2 = vadd.f32 %v5307_v63, %v1711_v4 }
 0x1b6   : > { %v1714_v23 = vpop.f32.mrb[3].mxu1  ;;  %v3766_v27 = vadd.f32 %v3561_v5, %v5307_v63 }
 0x1b7   : > { %v3768_v24 = vadd.f32 %v5307_v63, %v1714_v23 }
 0x1bb   : > { %v3564_v25 = vpop.f32.mrb[4].mxu1 }
 0x1bc   : > { %v1727_v55 = vpop.f32.mrb[5].mxu1  ;;  %v3770_v52 = vadd.f32 %v3564_v25, %v5307_v63 }
 0x1bd   : > { %v3565_v26 = vpop.f32.mrb[6].mxu1  ;;  %v3772_v13 = vadd.f32 %v5307_v63, %v1727_v55 }
 0x1be   : > { %v1730_v51 = vpop.f32.mrb[7].mxu1  ;;  %v3774_v46 = vadd.f32 %v3565_v26, %v5307_v63 }
 0x1bf   : > { %v3776_v6 = vadd.f32 %v5307_v63, %v1730_v51 }
 0x1c3   : > { %v3568_v44 = vpop.f32.mrb[8].mxu1 }
 0x1c4   : > { %v1743_v61 = vpop.f32.mrb[9].mxu1  ;;  %v3778_v36 = vadd.f32 %v3568_v44, %v5307_v63 }
 0x1c5   : > { %v3569_v21 = vpop.f32.mrb[10].mxu1  ;;  %v3780_v42 = vadd.f32 %v5307_v63, %v1743_v61 }
 0x1c6   : > { %v1746_v47 = vpop.f32.mrb[11].mxu1  ;;  %v3782_v58 = vadd.f32 %v3569_v21, %v5307_v63 }
 0x1c7   : > { %v3784_v50 = vadd.f32 %v5307_v63, %v1746_v47 }
 0x1cb   : > { %v5295_v14 = vpop.f32.mrb[12].mxu1 }
 0x1cc   : > { %v5297_v60 = vpop.f32.mrb[13].mxu1  ;;  %v3786_v43 = vadd.f32 %v5295_v14, %v5307_v63 }
 0x1cd   : > { %v5299_v1 = vpop.f32.mrb[14].mxu1  ;;  %v3788_v37 = vadd.f32 %v5307_v63, %v5297_v60 }
 0x1ce   : > { %v5301_v54 = vpop.f32.mrb[15].mxu1  ;;  %v3790_v11 = vadd.f32 %v5299_v1, %v5307_v63 }
 0x1cf   : > { %v3792_v23 = vadd.f32 %v5307_v63, %v5301_v54 }
 0x1e5   : > { %v3730_v41 = vpop.f32.mrb[0].mxu0 }
 0x1e6   : > { %v3763_v35 = vadd.f32 %v3762_v19, %v3730_v41  ;;  %v2797_v18 = vpop.f32.mrb[1].mxu0 }
 0x1e7   : > { %v3765_v57 = vadd.f32 %v3764_v2, %v2797_v18  ;;  %v3731_v38 = vpop.f32.mrb[2].mxu0 }
 0x1e8   : > { %2958 = vst [vmem:[%s5315_s8 + $0x10] sm:$0xff] %v3763_v35  ;;  %v3767_v39 = vadd.f32 %v3766_v27, %v3731_v38  ;;  %v2800_v45 = vpop.f32.mrb[3].mxu0 }
 0x1e9   : > { %2956 = vst [vmem:[%s5315_s8] sm:$0xff] %v3765_v57  ;;  %v3769_v9 = vadd.f32 %v3768_v24, %v2800_v45 }
 0x1ea   : > { %2959 = vst [vmem:[%s5315_s8 + $0x18] sm:$0xff] %v3767_v39 }
 0x1eb   : > { %2957 = vst [vmem:[%s5315_s8 + $0x8] sm:$0xff] %v3769_v9 }
 0x1ed   : > { %v3734_v29 = vpop.f32.mrb[4].mxu0 }
 0x1ee   : > { %v3771_v40 = vadd.f32 %v3770_v52, %v3734_v29  ;;  %v2813_v20 = vpop.f32.mrb[5].mxu0 }
 0x1ef   : > { %v3773_v32 = vadd.f32 %v3772_v13, %v2813_v20  ;;  %v3735_v49 = vpop.f32.mrb[6].mxu0 }
 0x1f0   : > { %2962 = vst [vmem:[%s5315_s8 + $0x30] sm:$0xff] %v3771_v40  ;;  %v3775_v7 = vadd.f32 %v3774_v46, %v3735_v49  ;;  %v2816_v28 = vpop.f32.mrb[7].mxu0 }
 0x1f1   : > { %2960 = vst [vmem:[%s5315_s8 + $0x20] sm:$0xff] %v3773_v32  ;;  %v3777_v10 = vadd.f32 %v3776_v6, %v2816_v28 }
 0x1f2   : > { %2963 = vst [vmem:[%s5315_s8 + $0x38] sm:$0xff] %v3775_v7 }
 0x1f3   : > { %v3610_v15 = vpop.f32.mrb[16].mxu1  ;;  %2961 = vst [vmem:[%s5315_s8 + $0x28] sm:$0xff] %v3777_v10 }
 0x1f4   : > { %v2003_v17 = vpop.f32.mrb[17].mxu1  ;;  %v3794_v60 = vadd.f32 %v3610_v15, %v5307_v63 }
 0x1f5   : > { %v3611_v22 = vpop.f32.mrb[18].mxu1  ;;  %v3738_v12 = vpop.f32.mrb[8].mxu0  ;;  %v3796_v1 = vadd.f32 %v5307_v63, %v2003_v17 }
 0x1f6   : > { %v2006_v3 = vpop.f32.mrb[19].mxu1  ;;  %v3779_v59 = vadd.f32 %v3778_v36, %v3738_v12  ;;  %v2829_v30 = vpop.f32.mrb[9].mxu0  ;;  %v3798_v19 = vadd.f32 %v3611_v22, %v5307_v63 }
 0x1f7   : > { %v3781_v62 = vadd.f32 %v3780_v42, %v2829_v30  ;;  %v3739_v33 = vpop.f32.mrb[10].mxu0  ;;  %v3800_v27 = vadd.f32 %v5307_v63, %v2006_v3 }
 0x1f8   : > { %2966 = vst [vmem:[%s5315_s8 + $0x50] sm:$0xff] %v3779_v59  ;;  %v3783_v48 = vadd.f32 %v3782_v58, %v3739_v33  ;;  %v2832_v56 = vpop.f32.mrb[11].mxu0 }
 0x1f9   : > { %2964 = vst [vmem:[%s5315_s8 + $0x40] sm:$0xff] %v3781_v62  ;;  %v3785_v53 = vadd.f32 %v3784_v50, %v2832_v56 }
 0x1fa   : > { %2967 = vst [vmem:[%s5315_s8 + $0x58] sm:$0xff] %v3783_v48 }
 0x1fb   : > { %v3614_v8 = vpop.f32.mrb[20].mxu1  ;;  %2965 = vst [vmem:[%s5315_s8 + $0x48] sm:$0xff] %v3785_v53 }
 0x1fc   : > { %v2019_v34 = vpop.f32.mrb[21].mxu1  ;;  %v3802_v13 = vadd.f32 %v3614_v8, %v5307_v63 }
 0x1fd   : > { %v3615_v16 = vpop.f32.mrb[22].mxu1  ;;  %v3742_v0 = vpop.f32.mrb[12].mxu0  ;;  %v3804_v29 = vadd.f32 %v5307_v63, %v2019_v34 }
 0x1fe   : > { %v2022_v31 = vpop.f32.mrb[23].mxu1  ;;  %v3787_v4 = vadd.f32 %v3786_v43, %v3742_v0  ;;  %v2845_v5 = vpop.f32.mrb[13].mxu0  ;;  %v3806_v40 = vadd.f32 %v3615_v16, %v5307_v63 }
 0x1ff   : > { %v3789_v25 = vadd.f32 %v3788_v37, %v2845_v5  ;;  %v3743_v55 = vpop.f32.mrb[14].mxu0  ;;  %v3808_v32 = vadd.f32 %v5307_v63, %v2022_v31 }
 0x200   : > { %2970 = vst [vmem:[%s5315_s8 + $0x70] sm:$0xff] %v3787_v4  ;;  %v3791_v26 = vadd.f32 %v3790_v11, %v3743_v55  ;;  %v2848_v51 = vpop.f32.mrb[15].mxu0 }
 0x201   : > { %2968 = vst [vmem:[%s5315_s8 + $0x60] sm:$0xff] %v3789_v25  ;;  %v3793_v61 = vadd.f32 %v3792_v23, %v2848_v51 }
 0x202   : > { %2971 = vst [vmem:[%s5315_s8 + $0x78] sm:$0xff] %v3791_v26 }
 0x203   : > { %v3618_v44 = vpop.f32.mrb[24].mxu1  ;;  %2969 = vst [vmem:[%s5315_s8 + $0x68] sm:$0xff] %v3793_v61 }
 0x204   : > { %v2035_v21 = vpop.f32.mrb[25].mxu1  ;;  %v3810_v17 = vadd.f32 %v3618_v44, %v5307_v63 }
 0x205   : > { %v3619_v47 = vpop.f32.mrb[26].mxu1  ;;  %v3746_v54 = vpop.f32.mrb[16].mxu0  ;;  %v3812_v22 = vadd.f32 %v5307_v63, %v2035_v21 }
 0x206   : > { %v2038_v14 = vpop.f32.mrb[27].mxu1  ;;  %v3795_v2 = vadd.f32 %v3794_v60, %v3746_v54  ;;  %v2861_v41 = vpop.f32.mrb[17].mxu0  ;;  %v3814_v36 = vadd.f32 %v3619_v47, %v5307_v63 }
 0x207   : > { %v3797_v35 = vadd.f32 %v3796_v1, %v2861_v41  ;;  %v3747_v18 = vpop.f32.mrb[18].mxu0  ;;  %v3816_v58 = vadd.f32 %v5307_v63, %v2038_v14 }
 0x208   : > { %2974 = vst [vmem:[%s5315_s8 + $0x90] sm:$0xff] %v3795_v2  ;;  %v3799_v24 = vadd.f32 %v3798_v19, %v3747_v18  ;;  %v2864_v57 = vpop.f32.mrb[19].mxu0 }
 0x209   : > { %2972 = vst [vmem:[%s5315_s8 + $0x80] sm:$0xff] %v3797_v35  ;;  %v3801_v39 = vadd.f32 %v3800_v27, %v2864_v57 }
 0x20a   : > { %2975 = vst [vmem:[%s5315_s8 + $0x98] sm:$0xff] %v3799_v24 }
 0x20b   : > { %v3622_v38 = vpop.f32.mrb[28].mxu1  ;;  %2973 = vst [vmem:[%s5315_s8 + $0x88] sm:$0xff] %v3801_v39 }
 0x20c   : > { %v2051_v45 = vpop.f32.mrb[29].mxu1  ;;  %v3818_v48 = vadd.f32 %v3622_v38, %v5307_v63 }
 0x20d   : > { %v3623_v9 = vpop.f32.mrb[30].mxu1  ;;  %v3750_v46 = vpop.f32.mrb[20].mxu0  ;;  %v3820_v56 = vadd.f32 %v5307_v63, %v2051_v45 }
 0x20e   : > { %v2054_v52 = vpop.f32.mrb[31].mxu1  ;;  %v3803_v20 = vadd.f32 %v3802_v13, %v3750_v46  ;;  %v2877_v6 = vpop.f32.mrb[21].mxu0  ;;  %v3822_v53 = vadd.f32 %v3623_v9, %v5307_v63 }
 0x20f   : > { %v3805_v49 = vadd.f32 %v3804_v29, %v2877_v6  ;;  %v3751_v7 = vpop.f32.mrb[22].mxu0  ;;  %v3824_v31 = vadd.f32 %v5307_v63, %v2054_v52 }
 0x210   : > { %2978 = vst [vmem:[%s5315_s8 + $0xb0] sm:$0xff] %v3803_v20  ;;  %v3807_v28 = vadd.f32 %v3806_v40, %v3751_v7  ;;  %v2880_v15 = vpop.f32.mrb[23].mxu0 }
 0x211   : > { %2976 = vst [vmem:[%s5315_s8 + $0xa0] sm:$0xff] %v3805_v49  ;;  %v3809_v10 = vadd.f32 %v3808_v32, %v2880_v15 }
 0x212   : > { %2979 = vst [vmem:[%s5315_s8 + $0xb8] sm:$0xff] %v3807_v28 }
 0x213   : > { %2977 = vst [vmem:[%s5315_s8 + $0xa8] sm:$0xff] %v3809_v10 }
 0x215   : > { %v3754_v3 = vpop.f32.mrb[24].mxu0 }
 0x216   : > { %v3811_v42 = vadd.f32 %v3810_v17, %v3754_v3  ;;  %v2893_v12 = vpop.f32.mrb[25].mxu0 }
 0x217   : > { %v3813_v59 = vadd.f32 %v3812_v22, %v2893_v12  ;;  %v3755_v30 = vpop.f32.mrb[26].mxu0 }
 0x218   : > { %2982 = vst [vmem:[%s5315_s8 + $0xd0] sm:$0xff] %v3811_v42  ;;  %v3815_v50 = vadd.f32 %v3814_v36, %v3755_v30  ;;  %v2896_v62 = vpop.f32.mrb[27].mxu0 }
 0x219   : > { %2980 = vst [vmem:[%s5315_s8 + $0xc0] sm:$0xff] %v3813_v59  ;;  %v3817_v33 = vadd.f32 %v3816_v58, %v2896_v62 }
 0x21a   : > { %2983 = vst [vmem:[%s5315_s8 + $0xd8] sm:$0xff] %v3815_v50 }
 0x21b   : > { %2981 = vst [vmem:[%s5315_s8 + $0xc8] sm:$0xff] %v3817_v33 }
 0x21d   : > { %v3758_v8 = vpop.f32.mrb[28].mxu0 }
 0x21e   : > { %v3819_v34 = vadd.f32 %v3818_v48, %v3758_v8  ;;  %v2909_v16 = vpop.f32.mrb[29].mxu0 }
 0x21f   : > { %v3821_v43 = vadd.f32 %v3820_v56, %v2909_v16  ;;  %v3759_v37 = vpop.f32.mrb[30].mxu0 }
 0x220   : > { %2986 = vst [vmem:[%s5315_s8 + $0xf0] sm:$0xff] %v3819_v34  ;;  %v3823_v0 = vadd.f32 %v3822_v53, %v3759_v37  ;;  %v2912_v11 = vpop.f32.mrb[31].mxu0 }
 0x221   : > { %2984 = vst [vmem:[%s5315_s8 + $0xe0] sm:$0xff] %v3821_v43  ;;  %v3825_v4 = vadd.f32 %v3824_v31, %v2912_v11 }
 0x222   : > { %2987 = vst [vmem:[%s5315_s8 + $0xf8] sm:$0xff] %v3823_v0 }
 0x223   : > { %2985 = vst [vmem:[%s5315_s8 + $0xe8] sm:$0xff] %v3825_v4 }
 0x224   : > { %4134 = shalt.err (!%p4131_p3)
}
 0x225   : > { %s4135_s27 = scalar_lea.hbm %s5383_s19, 4096  ;;  %s4139_s30 = scalar_lea.hbm %s5436_s3, 8192 }
 0x226   : > { %p4136_p4 = scmp.ne.s32.totalorder %s5383_s19, %s4135_s27  ;;  %p4140_p9 = scmp.lt.u32.totalorder %s5383_s19, %s5436_s3 }
 0x227   : > { %p4141_p10 = scmp.lt.u32.totalorder %s4139_s30, %s4135_s27  ;;  %p4143_p12 = scmp.lt.u32.totalorder %s4135_s27, %s5383_s19 }
 0x228   : > { %p4137_p7 = pnand %p4136_p4, %p4246_p5 }
 0x229   : > { %p4142_p11 = por %p4141_p10, %p4140_p9 }
 0x22a   : > { %p4138_p8 = pneg %p4137_p7 }
 0x22b   : > { %p4144_p13 = por %p4143_p12, %p4142_p11 }
 0x22d   : > { %p4145_p0 = pnand %p4144_p13, %p4138_p8 }
 0x22f   : > { %4148 = shalt.err (!%p4145_p0)
}
 0x230   : > { %s4186_s6 = smov 128   ;;  %s4187_s7 = smov 8  }
 0x231   : > { %4061 = dma.vmem_to_hbm [thread:$0]  (%p4246_p5), %s5385_s10, 4096, %s5383_s19, %s5392_s16, %s4186_s6, %s4186_s6, %s4187_s7  }
 0x232 PF: > { %p4067_p1 = scmp.ge.s32.totalorder %s4183_s15, 2  ;;  %s3017_s8 = sand.u32 1, %s4171_s12  }
 0x233   : > { %s3018_s9 = scalar_lea.sflag [#allocation3], %s3017_s8 }
 0x234   : > { %p4064_p2 = pnand %p4067_p1, %p4250_p6 }
 0x236   : > { %4166 = dma.done.wait (!%p4064_p2), %s3018_s9, 4096  }
 0x237   : > { %4168 = vsyncadd (!%p4064_p2), %s3018_s9, 4294963200  ;;  %p13_p3 = scmp.ge.s32.totalorder %s4233_s18, 4   ;;  %s5566_s12 = smov %s4175_s13 }
 0x238   : > { %s5567_s13 = smov %s4179_s14  ;;  %s5568_s14 = smov %s4244_s21 }
 0x239   : > { %s5569_s15 = smov %s4233_s18  ;;  %15 = sbr.rel (!%p13_p3) target bundleno = 3 (0x3), region = 75 }
 0x240   :  { %3023 = vsyncpa [#allocation3], 1 }
 0x241   :  { %3025 = vsyncpa [#allocation3 + $0x1], 1 }

</bundles_post_ra>
